<compile_context>
chip_gen: v7x
topology: tpu7x:2x2x1
jax: 0.10.0
libtpu: 0.0.40
codegen_flags: <defaults>
</compile_context>

<pallas_src>
import functools

import jax
import jax.numpy as jnp
from jax.experimental import pallas as pl
from jax.experimental.pallas import tpu as pltpu

NEG_SLOPE = 0.1
BN_EPS = 1e-5
# Safe on every generation (<= v7x 64 MiB physical per TC); actual working sets are << this.
VMEM_LIMIT_BYTES = 32 * 1024 * 1024


def _round_up(x, m):
    return (x + m - 1) // m * m


# ----------------------------------------------------------------------------
# Fused 3x3 / stride-1 / pad-1 conv + bias + BN + LeakyReLU (no HBM im2col)
# ----------------------------------------------------------------------------
def _conv3x3_row_kernel(x0_ref, x1_ref, x2_ref, w_ref, shift_ref, o_ref):
    # x*_ref: (Wp, C) bf16 -- padded input rows h, h+1, h+2 for output row h
    # w_ref:  (9, C, OC) bf16 with BN scale pre-folded; shift_ref: (1, OC) f32
    # o_ref:  (Wo, OC) bf16 -- one output row, stored directly in NHWC layout
    wo, _ = o_ref.shape
    rows = (x0_ref[...], x1_ref[...], x2_ref[...])
    acc = jnp.zeros(o_ref.shape, jnp.float32)
    for i in range(3):            # kh taps (row-shifted inputs)
        xi = rows[i]
        for j in range(3):        # kw taps (static in-kernel slices along W)
            acc += jnp.dot(xi[j:j + wo, :], w_ref[i * 3 + j],
                           preferred_element_type=jnp.float32)
    y = acc + shift_ref[...]
    o_ref[...] = jnp.where(y >= 0, y, NEG_SLOPE * y).astype(o_ref.dtype)


def conv3x3_s1(x, w9, shift):
    """x: (B,H,W,C) bf16 NHWC; w9: (9,C,OC) bf16; shift: (1,OC) f32 -> (B,H,W,OC) bf16."""
    B, H, W, C = x.shape
    OC = w9.shape[-1]
    xp = jnp.pad(x, ((0, 0), (1, 1), (1, 1), (0, 0)))    # single cheap spatial pad
    Hp, Wp = H + 2, W + 2

    def row_spec(i):
        # Block height 1 along H (squeezed) => block index == padded row index h + i.
        return pl.BlockSpec((None, None, Wp, C), lambda b, h: (b, h + i, 0, 0))

    return pl.pallas_call(
        _conv3x3_row_kernel,
        out_shape=jax.ShapeDtypeStruct((B, H, W, OC), jnp.bfloat16),
        grid=(B, H),
        in_specs=[
            row_spec(0), row_spec(1), row_spec(2),                 # same array, 3 shifted views
            pl.BlockSpec((9, C, OC), lambda b, h: (0, 0, 0)),      # weights resident
            pl.BlockSpec((1, OC), lambda b, h: (0, 0)),            # shift resident
        ],
        out_specs=pl.BlockSpec((None, None, W, OC), lambda b, h: (b, h, 0, 0)),
        compiler_params=pltpu.CompilerParams(
            dimension_semantics=("parallel", "parallel"),          # v7x megacore split
            vmem_limit_bytes=VMEM_LIMIT_BYTES,
        ),
    )(xp, xp, xp, w9, shift)


# ----------------------------------------------------------------------------
# im2col matmul path for the 4x4 / stride-2 layers
# ----------------------------------------------------------------------------
def _fused_conv_mm_kernel(a_ref, w_ref, shift_ref, o_ref):
    # a: (tm, K) bf16 patches, w: (K, OC) bf16, shift: (1, OC) f32; f32 accum, bf16 store.
    acc = jnp.dot(a_ref[...], w_ref[...], preferred_element_type=jnp.float32)
    y = acc + shift_ref[...]
    o_ref[...] = jnp.where(y >= 0, y, NEG_SLOPE * y).astype(o_ref.dtype)


def fused_conv_mm(a, w, shift, tm):
    """leaky_relu((a @ w) + shift) tiled over M; K and N kept at full extent (no padding)."""
    M, K = a.shape
    _, N = w.shape
    assert M % tm == 0
    return pl.pallas_call(
        _fused_conv_mm_kernel,
        out_shape=jax.ShapeDtypeStruct((M, N), jnp.bfloat16),
        grid=(M // tm,),
        in_specs=[
            pl.BlockSpec((tm, K), lambda i: (i, 0)),   # patch tile, K full-extent (no 128 pad)
            pl.BlockSpec((K, N), lambda i: (0, 0)),    # weights resident
            pl.BlockSpec((1, N), lambda i: (0, 0)),    # shift resident
        ],
        out_specs=pl.BlockSpec((tm, N), lambda i: (i, 0)),
        compiler_params=pltpu.CompilerParams(
            dimension_semantics=("parallel",),
            vmem_limit_bytes=VMEM_LIMIT_BYTES,
        ),
    )(a, w, shift)


def _pick_tm(M, K, cap=1024):
    """Pick an M-tile: multiple of 16 dividing M (or full extent), VMEM- and v7x-aware."""
    # keep double-buffered bf16 patch tiles well under the VMEM budget
    while cap > 128 and cap * K * 2 * 2 > 12 * 2 ** 20:
        cap //= 2
    # v7x megacore: prefer >= ~8 grid steps (>= 4 per TensorCore) when M is large enough
    if M >= 8 * 128:
        cap = min(cap, max(128, (M // 8) // 16 * 16))
    if M <= cap:
        return M                      # single block, full extent (no M padding needed)
    for t in range(cap - cap % 16, 15, -16):
        if M % t == 0:
            return t
    return None                       # caller falls back to pad + slice


def im2col(x, kh, kw, stride, pad):
    """x: (B, H, W, C) -> patches (B*Ho*Wo, kh*kw*C) with (i, j, c) ordering, plus (Ho, Wo)."""
    B, H, W, C = x.shape
    xp = jnp.pad(x, ((0, 0), (pad, pad), (pad, pad), (0, 0)))
    Hp, Wp = H + 2 * pad, W + 2 * pad
    Ho = (Hp - kh) // stride + 1
    Wo = (Wp - kw) // stride + 1
    cols = []
    for i in range(kh):
        for j in range(kw):
            cols.append(
                xp[:, i:i + (Ho - 1) * stride + 1:stride,
                       j:j + (Wo - 1) * stride + 1:stride, :])
    p = jnp.stack(cols, axis=3)                       # (B, Ho, Wo, kh*kw, C)
    return p.reshape(B * Ho * Wo, kh * kw * C), Ho, Wo


def conv4x4_s2(x, w2d, shift, oc):
    """4x4 stride-2 pad-1 conv via im2col + tiled Pallas matmul; bf16 in/out, NHWC out."""
    B = x.shape[0]
    patches, Ho, Wo = im2col(x, 4, 4, 2, 1)           # bf16 patches
    M, K = patches.shape
    tm = _pick_tm(M, K)
    if tm is None:
        # No nice divisor: pad M to a multiple of 16-aligned tm and slice after (rare path).
        tm = 512
        Mp = _round_up(M, tm)
        patches = jnp.pad(patches, ((0, Mp - M), (0, 0)))
        y = fused_conv_mm(patches, w2d, shift, tm)[:M]
    else:
        y = fused_conv_mm(patches, w2d, shift, tm)
    return y.reshape(B, Ho, Wo, oc)                   # free reshape: Mp==M, N==oc


# ----------------------------------------------------------------------------
# Global average pool (AdaptiveAvgPool2d(1) + view)
# ----------------------------------------------------------------------------
def _global_pool_kernel(x_ref, o_ref, *, inv_hw):
    j = pl.program_id(0)

    @pl.when(j == 0)
    def _():
        o_ref[...] = jnp.zeros_like(o_ref)

    o_ref[...] += jnp.sum(x_ref[...].astype(jnp.float32), axis=1)   # f32 accumulation

    @pl.when(j == pl.num_programs(0) - 1)
    def _():
        o_ref[...] = o_ref[...] * inv_hw


def _pick_pool_tile(hw, cap=2048):
    if hw <= cap:
        return hw
    for t in range(cap - cap % 16, 15, -16):
        if hw % t == 0:
            return t
    return hw


def global_avg_pool(x):
    """x: (B, HW, C) bf16 -> (B, C) f32 mean over the spatial axis, tiled over HW."""
    B, HW, C = x.shape
    thw = _pick_pool_tile(HW)
    return pl.pallas_call(
        functools.partial(_global_pool_kernel, inv_hw=1.0 / HW),
        out_shape=jax.ShapeDtypeStruct((B, C), jnp.float32),
        grid=(HW // thw,),
        in_specs=[pl.BlockSpec((B, thw, C), lambda j: (0, j, 0))],
        out_specs=pl.BlockSpec((B, C), lambda j: (0, 0)),
        compiler_params=pltpu.CompilerParams(
            dimension_semantics=("arbitrary",),        # reduction axis, accumulator output
            vmem_limit_bytes=VMEM_LIMIT_BYTES,
        ),
    )(x)


# ----------------------------------------------------------------------------
# Parameter folding & forward pass
# ----------------------------------------------------------------------------
# (name, kernel, stride, pad, has_bn)
LAYER_DEFS = [
    ("conv0_0", 3, 1, 1, False),
    ("conv0_1", 4, 2, 1, True),
    ("conv1_0", 3, 1, 1, True),
    ("conv1_1", 4, 2, 1, True),
    ("conv2_0", 3, 1, 1, True),
    ("conv2_1", 4, 2, 1, True),
]


def fold_scale_shift(bias, bn):
    """Fold conv bias + inference BatchNorm into per-channel (scale, shift), both (OC,)."""
    if bn is None:
        return jnp.ones_like(bias), bias
    gamma, beta, mean, var = bn
    scale = gamma / jnp.sqrt(var + BN_EPS)
    shift = beta - mean * scale + bias * scale
    return scale, shift


def encoder_forward_pallas(x_nchw, params):
    x = jnp.transpose(x_nchw, (0, 2, 3, 1)).astype(jnp.bfloat16)   # NHWC, bf16 activations
    for name, k, stride, pad, has_bn in LAYER_DEFS:
        w = params[name]["w"]                      # (OC, IC, k, k) as in PyTorch
        b = params[name]["b"]                      # (OC,)
        bn = params[name]["bn"] if has_bn else None
        oc, ic = int(w.shape[0]), int(w.shape[1])

        scale, shift = fold_scale_shift(b, bn)
        shift2d = shift[None, :].astype(jnp.float32)
        w_hwio = jnp.transpose(w, (2, 3, 1, 0)) * scale            # fold BN scale in f32

        if k == 3 and stride == 1:
            w9 = w_hwio.reshape(9, ic, oc).astype(jnp.bfloat16)
            x = conv3x3_s1(x, w9, shift2d)                         # fused, no HBM im2col
        else:
            w2d = w_hwio.reshape(k * k * ic, oc).astype(jnp.bfloat16)
            x = conv4x4_s2(x, w2d, shift2d, oc)

    B, H, W, C = x.shape
    return global_avg_pool(x.reshape(B, H * W, C))                 # (B, C) f32


# ----------------------------------------------------------------------------
# References (for correctness check)
# ----------------------------------------------------------------------------
def encoder_forward_ref_f32(x_nchw, params):
    """Pure f32 reference (matches the PyTorch eval-mode module)."""
    x = jnp.transpose(x_nchw, (0, 2, 3, 1)).astype(jnp.float32)
    for name, k, stride, pad, has_bn in LAYER_DEFS:
        w = params[name]["w"]
        b = params[name]["b"]
        w_hwio = jnp.transpose(w, (2, 3, 1, 0))
        y = jax.lax.conv_general_dilated(
            x, w_hwio, window_strides=(stride, stride),
            padding=[(pad, pad), (pad, pad)],
            dimension_numbers=("NHWC", "HWIO", "NHWC"),
        ) + b
        if has_bn:
            gamma, beta, mean, var = params[name]["bn"]
            y = gamma * (y - mean) / jnp.sqrt(var + BN_EPS) + beta
        x = jnp.where(y >= 0, y, NEG_SLOPE * y)
    return jnp.mean(x, axis=(1, 2))


def encoder_forward_ref_mixed(x_nchw, params):
    """Reference with the kernel's precision policy (bf16 weights/activations, f32 accum)."""
    x = jnp.transpose(x_nchw, (0, 2, 3, 1)).astype(jnp.bfloat16)
    for name, k, stride, pad, has_bn in LAYER_DEFS:
        w = params[name]["w"]
        b = params[name]["b"]
        bn = params[name]["bn"] if has_bn else None
        scale, shift = fold_scale_shift(b, bn)
        w_hwio = (jnp.transpose(w, (2, 3, 1, 0)) * scale).astype(jnp.bfloat16)
        y = jax.lax.conv_general_dilated(
            x, w_hwio, window_strides=(stride, stride),
            padding=[(pad, pad), (pad, pad)],
            dimension_numbers=("NHWC", "HWIO", "NHWC"),
            preferred_element_type=jnp.float32,
        ) + shift
        x = jnp.where(y >= 0, y, NEG_SLOPE * y).astype(jnp.bfloat16)
    return jnp.mean(x.astype(jnp.float32), axis=(1, 2))


# ----------------------------------------------------------------------------
# Deterministic parameter init
# ----------------------------------------------------------------------------
def init_params(key, nf, in_nc):
    chans = [
        ("conv0_0", in_nc, nf),
        ("conv0_1", nf, nf),
        ("conv1_0", nf, nf * 2),
        ("conv1_1", nf * 2, nf * 2),
        ("conv2_0", nf * 2, nf * 4),
        ("conv2_1", nf * 4, nf * 4),
    ]
    params = {}
    for (name, k, _, _, has_bn), (_, ic, oc) in zip(LAYER_DEFS, chans):
        key, kw_, kb_, kg, kbta, km, kv = jax.random.split(key, 7)
        fan_in = ic * k * k
        params[name] = {
            "w": jax.random.normal(kw_, (oc, ic, k, k), jnp.float32) / jnp.sqrt(fan_in),
            "b": 0.01 * jax.random.normal(kb_, (oc,), jnp.float32),
            "bn": None,
        }
        if has_bn:
            params[name]["bn"] = (
                1.0 + 0.1 * jax.random.normal(kg, (oc,), jnp.float32),   # gamma
                0.1 * jax.random.normal(kbta, (oc,), jnp.float32),       # beta
                0.1 * jax.random.normal(km, (oc,), jnp.float32),         # running_mean
                jax.random.uniform(kv, (oc,), jnp.float32, 0.5, 1.5),    # running_var
            )
    return params


# ----------------------------------------------------------------------------
if __name__ == "__main__":
    nf, in_nc = 8, 3           # small synthetic config (module default nf=32, in_nc=3)
    B, H, W = 2, 16, 16

    root = jax.random.PRNGKey(0)
    kx, kp = jax.random.split(root)
    x = jax.random.normal(kx, (B, in_nc, H, W), jnp.float32)   # NCHW input
    params = init_params(kp, nf, in_nc)

    fwd = jax.jit(functools.partial(encoder_forward_pallas, params=params))
    out = jax.block_until_ready(fwd(x))

    ref_mixed = jax.block_until_ready(
        jax.jit(functools.partial(encoder_forward_ref_mixed, params=params))(x))
    ref_f32 = jax.block_until_ready(
        jax.jit(functools.partial(encoder_forward_ref_f32, params=params))(x))

    assert out.shape == (B, nf * 4), out.shape
    err_mixed = float(jnp.max(jnp.abs(out - ref_mixed)))
    err_f32 = float(jnp.max(jnp.abs(out - ref_f32)))
    # Tight-ish check vs a reference with the same bf16 activation/weight policy (validates
    # kernel mechanics: taps, folding, tiling); looser check vs the pure-f32 PyTorch module.
    assert jnp.allclose(out, ref_mixed, rtol=2e-2, atol=2e-2), err_mixed
    assert jnp.allclose(out, ref_f32, rtol=8e-2, atol=8e-2), err_f32

    print("KERNEL_OK")
</pallas_src>

<mosaic_0001>
module attributes {stable_mosaic.version = 11 : i64} {
  func.func @_conv3x3_row_kernel(%arg0: i32, %arg1: i32, %arg2: memref<1x1x18x3xbf16, #tpu.memory_space<vmem>>, %arg3: memref<1x1x18x3xbf16, #tpu.memory_space<vmem>>, %arg4: memref<1x1x18x3xbf16, #tpu.memory_space<vmem>>, %arg5: memref<9x3x8xbf16, #tpu.memory_space<vmem>>, %arg6: memref<1x8xf32, #tpu.memory_space<vmem>>, %arg7: memref<1x1x16x8xbf16, #tpu.memory_space<vmem>>) attributes {dimension_semantics = [#tpu.dimension_semantics<parallel>, #tpu.dimension_semantics<parallel>], iteration_bounds = array<i64: 2, 16>, scalar_prefetch = 0 : i64, scratch_operands = 0 : i64, tpu.core_type = #tpu.core_type<tc>, window_params = [{transform_indices = @transform_0, window_bounds = array<i64: 1, 1, 18, 3>}, {transform_indices = @transform_1, window_bounds = array<i64: 1, 1, 18, 3>}, {transform_indices = @transform_2, window_bounds = array<i64: 1, 1, 18, 3>}, {pipeline_mode = #tpu.pipeline_mode<synchronous>, transform_indices = @transform_3, window_bounds = array<i64: 9, 3, 8>}, {pipeline_mode = #tpu.pipeline_mode<synchronous>, transform_indices = @transform_4, window_bounds = array<i64: 1, 8>}, {transform_indices = @transform_5, window_bounds = array<i64: 1, 1, 16, 8>}]} {
    %c0 = arith.constant 0 : index
    %c0_0 = arith.constant 0 : index
    %c0_1 = arith.constant 0 : index
    %c0_2 = arith.constant 0 : index
    %0 = vector.load %arg2[%c0, %c0_0, %c0_1, %c0_2] : memref<1x1x18x3xbf16, #tpu.memory_space<vmem>>, vector<1x1x18x3xbf16>
    %1 = vector.shape_cast %0 : vector<1x1x18x3xbf16> to vector<18x3xbf16>
    %c0_3 = arith.constant 0 : index
    %c0_4 = arith.constant 0 : index
    %c0_5 = arith.constant 0 : index
    %c0_6 = arith.constant 0 : index
    %2 = vector.load %arg3[%c0_3, %c0_4, %c0_5, %c0_6] : memref<1x1x18x3xbf16, #tpu.memory_space<vmem>>, vector<1x1x18x3xbf16>
    %3 = vector.shape_cast %2 : vector<1x1x18x3xbf16> to vector<18x3xbf16>
    %c0_7 = arith.constant 0 : index
    %c0_8 = arith.constant 0 : index
    %c0_9 = arith.constant 0 : index
    %c0_10 = arith.constant 0 : index
    %4 = vector.load %arg4[%c0_7, %c0_8, %c0_9, %c0_10] : memref<1x1x18x3xbf16, #tpu.memory_space<vmem>>, vector<1x1x18x3xbf16>
    %5 = vector.shape_cast %4 : vector<1x1x18x3xbf16> to vector<18x3xbf16>
    %cst = arith.constant 0.000000e+00 : f32
    %6 = vector.broadcast %cst : f32 to vector<16x8xf32>
    %7 = vector.extract_strided_slice %1 {offsets = [0, 0], sizes = [16, 3], strides = [1, 1]} : vector<18x3xbf16> to vector<16x3xbf16>
    %c0_11 = arith.constant 0 : index
    %c0_12 = arith.constant 0 : index
    %c0_13 = arith.constant 0 : index
    %8 = vector.load %arg5[%c0_11, %c0_12, %c0_13] : memref<9x3x8xbf16, #tpu.memory_space<vmem>>, vector<1x3x8xbf16>
    %9 = vector.shape_cast %8 : vector<1x3x8xbf16> to vector<3x8xbf16>
    %cst_14 = arith.constant dense<0.000000e+00> : vector<16x8xf32>
    %10 = tpu.matmul %7, %9, %cst_14 {dimension_numbers = #tpu.dot_dimension_numbers<[1], [0], [0], [1], [0, 0, 1, 1], [], []>} : vector<16x3xbf16>, vector<3x8xbf16>, vector<16x8xf32> -> vector<16x8xf32>
    %11 = arith.addf %6, %10 : vector<16x8xf32>
    %12 = vector.extract_strided_slice %1 {offsets = [1, 0], sizes = [16, 3], strides = [1, 1]} : vector<18x3xbf16> to vector<16x3xbf16>
    %c1 = arith.constant 1 : index
    %c0_15 = arith.constant 0 : index
    %c0_16 = arith.constant 0 : index
    %13 = vector.load %arg5[%c1, %c0_15, %c0_16] : memref<9x3x8xbf16, #tpu.memory_space<vmem>>, vector<1x3x8xbf16>
    %14 = vector.shape_cast %13 : vector<1x3x8xbf16> to vector<3x8xbf16>
    %cst_17 = arith.constant dense<0.000000e+00> : vector<16x8xf32>
    %15 = tpu.matmul %12, %14, %cst_17 {dimension_numbers = #tpu.dot_dimension_numbers<[1], [0], [0], [1], [0, 0, 1, 1], [], []>} : vector<16x3xbf16>, vector<3x8xbf16>, vector<16x8xf32> -> vector<16x8xf32>
    %16 = arith.addf %11, %15 : vector<16x8xf32>
    %17 = vector.extract_strided_slice %1 {offsets = [2, 0], sizes = [16, 3], strides = [1, 1]} : vector<18x3xbf16> to vector<16x3xbf16>
    %c2 = arith.constant 2 : index
    %c0_18 = arith.constant 0 : index
    %c0_19 = arith.constant 0 : index
    %18 = vector.load %arg5[%c2, %c0_18, %c0_19] : memref<9x3x8xbf16, #tpu.memory_space<vmem>>, vector<1x3x8xbf16>
    %19 = vector.shape_cast %18 : vector<1x3x8xbf16> to vector<3x8xbf16>
    %cst_20 = arith.constant dense<0.000000e+00> : vector<16x8xf32>
    %20 = tpu.matmul %17, %19, %cst_20 {dimension_numbers = #tpu.dot_dimension_numbers<[1], [0], [0], [1], [0, 0, 1, 1], [], []>} : vector<16x3xbf16>, vector<3x8xbf16>, vector<16x8xf32> -> vector<16x8xf32>
    %21 = arith.addf %16, %20 : vector<16x8xf32>
    %22 = vector.extract_strided_slice %3 {offsets = [0, 0], sizes = [16, 3], strides = [1, 1]} : vector<18x3xbf16> to vector<16x3xbf16>
    %c3 = arith.constant 3 : index
    %c0_21 = arith.constant 0 : index
    %c0_22 = arith.constant 0 : index
    %23 = vector.load %arg5[%c3, %c0_21, %c0_22] : memref<9x3x8xbf16, #tpu.memory_space<vmem>>, vector<1x3x8xbf16>
    %24 = vector.shape_cast %23 : vector<1x3x8xbf16> to vector<3x8xbf16>
    %cst_23 = arith.constant dense<0.000000e+00> : vector<16x8xf32>
    %25 = tpu.matmul %22, %24, %cst_23 {dimension_numbers = #tpu.dot_dimension_numbers<[1], [0], [0], [1], [0, 0, 1, 1], [], []>} : vector<16x3xbf16>, vector<3x8xbf16>, vector<16x8xf32> -> vector<16x8xf32>
    %26 = arith.addf %21, %25 : vector<16x8xf32>
    %27 = vector.extract_strided_slice %3 {offsets = [1, 0], sizes = [16, 3], strides = [1, 1]} : vector<18x3xbf16> to vector<16x3xbf16>
    %c4 = arith.constant 4 : index
    %c0_24 = arith.constant 0 : index
    %c0_25 = arith.constant 0 : index
    %28 = vector.load %arg5[%c4, %c0_24, %c0_25] : memref<9x3x8xbf16, #tpu.memory_space<vmem>>, vector<1x3x8xbf16>
    %29 = vector.shape_cast %28 : vector<1x3x8xbf16> to vector<3x8xbf16>
    %cst_26 = arith.constant dense<0.000000e+00> : vector<16x8xf32>
    %30 = tpu.matmul %27, %29, %cst_26 {dimension_numbers = #tpu.dot_dimension_numbers<[1], [0], [0], [1], [0, 0, 1, 1], [], []>} : vector<16x3xbf16>, vector<3x8xbf16>, vector<16x8xf32> -> vector<16x8xf32>
    %31 = arith.addf %26, %30 : vector<16x8xf32>
    %32 = vector.extract_strided_slice %3 {offsets = [2, 0], sizes = [16, 3], strides = [1, 1]} : vector<18x3xbf16> to vector<16x3xbf16>
    %c5 = arith.constant 5 : index
    %c0_27 = arith.constant 0 : index
    %c0_28 = arith.constant 0 : index
    %33 = vector.load %arg5[%c5, %c0_27, %c0_28] : memref<9x3x8xbf16, #tpu.memory_space<vmem>>, vector<1x3x8xbf16>
    %34 = vector.shape_cast %33 : vector<1x3x8xbf16> to vector<3x8xbf16>
    %cst_29 = arith.constant dense<0.000000e+00> : vector<16x8xf32>
    %35 = tpu.matmul %32, %34, %cst_29 {dimension_numbers = #tpu.dot_dimension_numbers<[1], [0], [0], [1], [0, 0, 1, 1], [], []>} : vector<16x3xbf16>, vector<3x8xbf16>, vector<16x8xf32> -> vector<16x8xf32>
    %36 = arith.addf %31, %35 : vector<16x8xf32>
    %37 = vector.extract_strided_slice %5 {offsets = [0, 0], sizes = [16, 3], strides = [1, 1]} : vector<18x3xbf16> to vector<16x3xbf16>
    %c6 = arith.constant 6 : index
    %c0_30 = arith.constant 0 : index
    %c0_31 = arith.constant 0 : index
    %38 = vector.load %arg5[%c6, %c0_30, %c0_31] : memref<9x3x8xbf16, #tpu.memory_space<vmem>>, vector<1x3x8xbf16>
    %39 = vector.shape_cast %38 : vector<1x3x8xbf16> to vector<3x8xbf16>
    %cst_32 = arith.constant dense<0.000000e+00> : vector<16x8xf32>
    %40 = tpu.matmul %37, %39, %cst_32 {dimension_numbers = #tpu.dot_dimension_numbers<[1], [0], [0], [1], [0, 0, 1, 1], [], []>} : vector<16x3xbf16>, vector<3x8xbf16>, vector<16x8xf32> -> vector<16x8xf32>
    %41 = arith.addf %36, %40 : vector<16x8xf32>
    %42 = vector.extract_strided_slice %5 {offsets = [1, 0], sizes = [16, 3], strides = [1, 1]} : vector<18x3xbf16> to vector<16x3xbf16>
    %c7 = arith.constant 7 : index
    %c0_33 = arith.constant 0 : index
    %c0_34 = arith.constant 0 : index
    %43 = vector.load %arg5[%c7, %c0_33, %c0_34] : memref<9x3x8xbf16, #tpu.memory_space<vmem>>, vector<1x3x8xbf16>
    %44 = vector.shape_cast %43 : vector<1x3x8xbf16> to vector<3x8xbf16>
    %cst_35 = arith.constant dense<0.000000e+00> : vector<16x8xf32>
    %45 = tpu.matmul %42, %44, %cst_35 {dimension_numbers = #tpu.dot_dimension_numbers<[1], [0], [0], [1], [0, 0, 1, 1], [], []>} : vector<16x3xbf16>, vector<3x8xbf16>, vector<16x8xf32> -> vector<16x8xf32>
    %46 = arith.addf %41, %45 : vector<16x8xf32>
    %47 = vector.extract_strided_slice %5 {offsets = [2, 0], sizes = [16, 3], strides = [1, 1]} : vector<18x3xbf16> to vector<16x3xbf16>
    %c8 = arith.constant 8 : index
    %c0_36 = arith.constant 0 : index
    %c0_37 = arith.constant 0 : index
    %48 = vector.load %arg5[%c8, %c0_36, %c0_37] : memref<9x3x8xbf16, #tpu.memory_space<vmem>>, vector<1x3x8xbf16>
    %49 = vector.shape_cast %48 : vector<1x3x8xbf16> to vector<3x8xbf16>
    %cst_38 = arith.constant dense<0.000000e+00> : vector<16x8xf32>
    %50 = tpu.matmul %47, %49, %cst_38 {dimension_numbers = #tpu.dot_dimension_numbers<[1], [0], [0], [1], [0, 0, 1, 1], [], []>} : vector<16x3xbf16>, vector<3x8xbf16>, vector<16x8xf32> -> vector<16x8xf32>
    %51 = arith.addf %46, %50 : vector<16x8xf32>
    %c0_39 = arith.constant 0 : index
    %c0_40 = arith.constant 0 : index
    %52 = vector.load %arg6[%c0_39, %c0_40] : memref<1x8xf32, #tpu.memory_space<vmem>>, vector<1x8xf32>
    %53 = vector.broadcast %52 : vector<1x8xf32> to vector<16x8xf32>
    %54 = arith.addf %51, %53 : vector<16x8xf32>
    %cst_41 = arith.constant 0.000000e+00 : f32
    %55 = vector.broadcast %cst_41 : f32 to vector<16x8xf32>
    %56 = arith.cmpf oge, %54, %55 : vector<16x8xf32>
    %cst_42 = arith.constant 1.000000e-01 : f32
    %57 = vector.broadcast %cst_42 : f32 to vector<16x8xf32>
    %58 = arith.mulf %57, %54 : vector<16x8xf32>
    %59 = arith.select %56, %54, %58 : vector<16x8xi1>, vector<16x8xf32>
    %60 = arith.truncf %59 : vector<16x8xf32> to vector<16x8xbf16>
    %c0_43 = arith.constant 0 : index
    %c0_44 = arith.constant 0 : index
    %c0_45 = arith.constant 0 : index
    %c0_46 = arith.constant 0 : index
    %61 = vector.load %arg7[%c0_43, %c0_44, %c0_45, %c0_46] : memref<1x1x16x8xbf16, #tpu.memory_space<vmem>>, vector<1x1x16x8xbf16>
    %62 = vector.shape_cast %61 : vector<1x1x16x8xbf16> to vector<16x8xbf16>
    %63 = vector.shape_cast %60 : vector<16x8xbf16> to vector<1x1x16x8xbf16>
    tpu.vector_store %arg7[%c0_43, %c0_44, %c0_45, %c0_46], %63 {strides = array<i32>} : memref<1x1x16x8xbf16, #tpu.memory_space<vmem>>, vector<1x1x16x8xbf16>,
    return
  }
  func.func @transform_0(%arg0: i32, %arg1: i32) -> (i32, i32, i32, i32) {
    %c0_i32 = arith.constant 0 : i32
    %0 = arith.addi %arg1, %c0_i32 : i32
    %c0_i32_0 = arith.constant 0 : i32
    %c0_i32_1 = arith.constant 0 : i32
    %c0_i32_2 = arith.constant 0 : i32
    return %arg0, %0, %c0_i32_0, %c0_i32_1 : i32, i32, i32, i32
  }
  func.func @transform_1(%arg0: i32, %arg1: i32) -> (i32, i32, i32, i32) {
    %c1_i32 = arith.constant 1 : i32
    %0 = arith.addi %arg1, %c1_i32 : i32
    %c0_i32 = arith.constant 0 : i32
    %c0_i32_0 = arith.constant 0 : i32
    %c0_i32_1 = arith.constant 0 : i32
    return %arg0, %0, %c0_i32, %c0_i32_0 : i32, i32, i32, i32
  }
  func.func @transform_2(%arg0: i32, %arg1: i32) -> (i32, i32, i32, i32) {
    %c2_i32 = arith.constant 2 : i32
    %0 = arith.addi %arg1, %c2_i32 : i32
    %c0_i32 = arith.constant 0 : i32
    %c0_i32_0 = arith.constant 0 : i32
    %c0_i32_1 = arith.constant 0 : i32
    return %arg0, %0, %c0_i32, %c0_i32_0 : i32, i32, i32, i32
  }
  func.func @transform_3(%arg0: i32, %arg1: i32) -> (i32, i32, i32) {
    %c0_i32 = arith.constant 0 : i32
    %c0_i32_0 = arith.constant 0 : i32
    %c0_i32_1 = arith.constant 0 : i32
    %c0_i32_2 = arith.constant 0 : i32
    return %c0_i32, %c0_i32_0, %c0_i32_1 : i32, i32, i32
  }
  func.func @transform_4(%arg0: i32, %arg1: i32) -> (i32, i32) {
    %c0_i32 = arith.constant 0 : i32
    %c0_i32_0 = arith.constant 0 : i32
    %c0_i32_1 = arith.constant 0 : i32
    return %c0_i32, %c0_i32_0 : i32, i32
  }
  func.func @transform_5(%arg0: i32, %arg1: i32) -> (i32, i32, i32, i32) {
    %c0_i32 = arith.constant 0 : i32
    %c0_i32_0 = arith.constant 0 : i32
    %c0_i32_1 = arith.constant 0 : i32
    return %arg0, %arg1, %c0_i32, %c0_i32_0 : i32, i32, i32, i32
  }
}

module attributes {stable_mosaic.version = 11 : i64} {
  func.func @_fused_conv_mm_kernel(%arg0: i32, %arg1: memref<128x128xbf16, #tpu.memory_space<vmem>>, %arg2: memref<128x8xbf16, #tpu.memory_space<vmem>>, %arg3: memref<1x8xf32, #tpu.memory_space<vmem>>, %arg4: memref<128x8xbf16, #tpu.memory_space<vmem>>) attributes {dimension_semantics = [#tpu.dimension_semantics<parallel>], iteration_bounds = array<i64: 1>, scalar_prefetch = 0 : i64, scratch_operands = 0 : i64, tpu.core_type = #tpu.core_type<tc>, window_params = [{transform_indices = @transform_0, window_bounds = array<i64: 128, 128>}, {pipeline_mode = #tpu.pipeline_mode<synchronous>, transform_indices = @transform_1, window_bounds = array<i64: 128, 8>}, {pipeline_mode = #tpu.pipeline_mode<synchronous>, transform_indices = @transform_2, window_bounds = array<i64: 1, 8>}, {transform_indices = @transform_3, window_bounds = array<i64: 128, 8>}]} {
    %c0 = arith.constant 0 : index
    %c0_0 = arith.constant 0 : index
    %0 = vector.load %arg1[%c0, %c0_0] : memref<128x128xbf16, #tpu.memory_space<vmem>>, vector<128x128xbf16>
    %c0_1 = arith.constant 0 : index
    %c0_2 = arith.constant 0 : index
    %1 = vector.load %arg2[%c0_1, %c0_2] : memref<128x8xbf16, #tpu.memory_space<vmem>>, vector<128x8xbf16>
    %cst = arith.constant dense<0.000000e+00> : vector<128x8xf32>
    %2 = tpu.matmul %0, %1, %cst {dimension_numbers = #tpu.dot_dimension_numbers<[1], [0], [0], [1], [0, 0, 1, 1], [], []>} : vector<128x128xbf16>, vector<128x8xbf16>, vector<128x8xf32> -> vector<128x8xf32>
    %c0_3 = arith.constant 0 : index
    %c0_4 = arith.constant 0 : index
    %3 = vector.load %arg3[%c0_3, %c0_4] : memref<1x8xf32, #tpu.memory_space<vmem>>, vector<1x8xf32>
    %4 = vector.broadcast %3 : vector<1x8xf32> to vector<128x8xf32>
    %5 = arith.addf %2, %4 : vector<128x8xf32>
    %cst_5 = arith.constant 0.000000e+00 : f32
    %6 = vector.broadcast %cst_5 : f32 to vector<128x8xf32>
    %7 = arith.cmpf oge, %5, %6 : vector<128x8xf32>
    %cst_6 = arith.constant 1.000000e-01 : f32
    %8 = vector.broadcast %cst_6 : f32 to vector<128x8xf32>
    %9 = arith.mulf %8, %5 : vector<128x8xf32>
    %10 = arith.select %7, %5, %9 : vector<128x8xi1>, vector<128x8xf32>
    %11 = arith.truncf %10 : vector<128x8xf32> to vector<128x8xbf16>
    %c0_7 = arith.constant 0 : index
    %c0_8 = arith.constant 0 : index
    %12 = vector.load %arg4[%c0_7, %c0_8] : memref<128x8xbf16, #tpu.memory_space<vmem>>, vector<128x8xbf16>
    tpu.vector_store %arg4[%c0_7, %c0_8], %11 {strides = array<i32>} : memref<128x8xbf16, #tpu.memory_space<vmem>>, vector<128x8xbf16>,
    return
  }
  func.func @transform_0(%arg0: i32) -> (i32, i32) {
    %c0_i32 = arith.constant 0 : i32
    %c0_i32_0 = arith.constant 0 : i32
    return %arg0, %c0_i32 : i32, i32
  }
  func.func @transform_1(%arg0: i32) -> (i32, i32) {
    %c0_i32 = arith.constant 0 : i32
    %c0_i32_0 = arith.constant 0 : i32
    %c0_i32_1 = arith.constant 0 : i32
    return %c0_i32, %c0_i32_0 : i32, i32
  }
  func.func @transform_2(%arg0: i32) -> (i32, i32) {
    %c0_i32 = arith.constant 0 : i32
    %c0_i32_0 = arith.constant 0 : i32
    %c0_i32_1 = arith.constant 0 : i32
    return %c0_i32, %c0_i32_0 : i32, i32
  }
  func.func @transform_3(%arg0: i32) -> (i32, i32) {
    %c0_i32 = arith.constant 0 : i32
    %c0_i32_0 = arith.constant 0 : i32
    return %arg0, %c0_i32 : i32, i32
  }
}

module attributes {stable_mosaic.version = 11 : i64} {
  func.func @_conv3x3_row_kernel(%arg0: i32, %arg1: i32, %arg2: memref<1x1x10x8xbf16, #tpu.memory_space<vmem>>, %arg3: memref<1x1x10x8xbf16, #tpu.memory_space<vmem>>, %arg4: memref<1x1x10x8xbf16, #tpu.memory_space<vmem>>, %arg5: memref<9x8x16xbf16, #tpu.memory_space<vmem>>, %arg6: memref<1x16xf32, #tpu.memory_space<vmem>>, %arg7: memref<1x1x8x16xbf16, #tpu.memory_space<vmem>>) attributes {dimension_semantics = [#tpu.dimension_semantics<parallel>, #tpu.dimension_semantics<parallel>], iteration_bounds = array<i64: 2, 8>, scalar_prefetch = 0 : i64, scratch_operands = 0 : i64, tpu.core_type = #tpu.core_type<tc>, window_params = [{transform_indices = @transform_0, window_bounds = array<i64: 1, 1, 10, 8>}, {transform_indices = @transform_1, window_bounds = array<i64: 1, 1, 10, 8>}, {transform_indices = @transform_2, window_bounds = array<i64: 1, 1, 10, 8>}, {pipeline_mode = #tpu.pipeline_mode<synchronous>, transform_indices = @transform_3, window_bounds = array<i64: 9, 8, 16>}, {pipeline_mode = #tpu.pipeline_mode<synchronous>, transform_indices = @transform_4, window_bounds = array<i64: 1, 16>}, {transform_indices = @transform_5, window_bounds = array<i64: 1, 1, 8, 16>}]} {
    %c0 = arith.constant 0 : index
    %c0_0 = arith.constant 0 : index
    %c0_1 = arith.constant 0 : index
    %c0_2 = arith.constant 0 : index
    %0 = vector.load %arg2[%c0, %c0_0, %c0_1, %c0_2] : memref<1x1x10x8xbf16, #tpu.memory_space<vmem>>, vector<1x1x10x8xbf16>
    %1 = vector.shape_cast %0 : vector<1x1x10x8xbf16> to vector<10x8xbf16>
    %c0_3 = arith.constant 0 : index
    %c0_4 = arith.constant 0 : index
    %c0_5 = arith.constant 0 : index
    %c0_6 = arith.constant 0 : index
    %2 = vector.load %arg3[%c0_3, %c0_4, %c0_5, %c0_6] : memref<1x1x10x8xbf16, #tpu.memory_space<vmem>>, vector<1x1x10x8xbf16>
    %3 = vector.shape_cast %2 : vector<1x1x10x8xbf16> to vector<10x8xbf16>
    %c0_7 = arith.constant 0 : index
    %c0_8 = arith.constant 0 : index
    %c0_9 = arith.constant 0 : index
    %c0_10 = arith.constant 0 : index
    %4 = vector.load %arg4[%c0_7, %c0_8, %c0_9, %c0_10] : memref<1x1x10x8xbf16, #tpu.memory_space<vmem>>, vector<1x1x10x8xbf16>
    %5 = vector.shape_cast %4 : vector<1x1x10x8xbf16> to vector<10x8xbf16>
    %cst = arith.constant 0.000000e+00 : f32
    %6 = vector.broadcast %cst : f32 to vector<8x16xf32>
    %7 = vector.extract_strided_slice %1 {offsets = [0, 0], sizes = [8, 8], strides = [1, 1]} : vector<10x8xbf16> to vector<8x8xbf16>
    %c0_11 = arith.constant 0 : index
    %c0_12 = arith.constant 0 : index
    %c0_13 = arith.constant 0 : index
    %8 = vector.load %arg5[%c0_11, %c0_12, %c0_13] : memref<9x8x16xbf16, #tpu.memory_space<vmem>>, vector<1x8x16xbf16>
    %9 = vector.shape_cast %8 : vector<1x8x16xbf16> to vector<8x16xbf16>
    %cst_14 = arith.constant dense<0.000000e+00> : vector<8x16xf32>
    %10 = tpu.matmul %7, %9, %cst_14 {dimension_numbers = #tpu.dot_dimension_numbers<[1], [0], [0], [1], [0, 0, 1, 1], [], []>} : vector<8x8xbf16>, vector<8x16xbf16>, vector<8x16xf32> -> vector<8x16xf32>
    %11 = arith.addf %6, %10 : vector<8x16xf32>
    %12 = vector.extract_strided_slice %1 {offsets = [1, 0], sizes = [8, 8], strides = [1, 1]} : vector<10x8xbf16> to vector<8x8xbf16>
    %c1 = arith.constant 1 : index
    %c0_15 = arith.constant 0 : index
    %c0_16 = arith.constant 0 : index
    %13 = vector.load %arg5[%c1, %c0_15, %c0_16] : memref<9x8x16xbf16, #tpu.memory_space<vmem>>, vector<1x8x16xbf16>
    %14 = vector.shape_cast %13 : vector<1x8x16xbf16> to vector<8x16xbf16>
    %cst_17 = arith.constant dense<0.000000e+00> : vector<8x16xf32>
    %15 = tpu.matmul %12, %14, %cst_17 {dimension_numbers = #tpu.dot_dimension_numbers<[1], [0], [0], [1], [0, 0, 1, 1], [], []>} : vector<8x8xbf16>, vector<8x16xbf16>, vector<8x16xf32> -> vector<8x16xf32>
    %16 = arith.addf %11, %15 : vector<8x16xf32>
    %17 = vector.extract_strided_slice %1 {offsets = [2, 0], sizes = [8, 8], strides = [1, 1]} : vector<10x8xbf16> to vector<8x8xbf16>
    %c2 = arith.constant 2 : index
    %c0_18 = arith.constant 0 : index
    %c0_19 = arith.constant 0 : index
    %18 = vector.load %arg5[%c2, %c0_18, %c0_19] : memref<9x8x16xbf16, #tpu.memory_space<vmem>>, vector<1x8x16xbf16>
    %19 = vector.shape_cast %18 : vector<1x8x16xbf16> to vector<8x16xbf16>
    %cst_20 = arith.constant dense<0.000000e+00> : vector<8x16xf32>
    %20 = tpu.matmul %17, %19, %cst_20 {dimension_numbers = #tpu.dot_dimension_numbers<[1], [0], [0], [1], [0, 0, 1, 1], [], []>} : vector<8x8xbf16>, vector<8x16xbf16>, vector<8x16xf32> -> vector<8x16xf32>
    %21 = arith.addf %16, %20 : vector<8x16xf32>
    %22 = vector.extract_strided_slice %3 {offsets = [0, 0], sizes = [8, 8], strides = [1, 1]} : vector<10x8xbf16> to vector<8x8xbf16>
    %c3 = arith.constant 3 : index
    %c0_21 = arith.constant 0 : index
    %c0_22 = arith.constant 0 : index
    %23 = vector.load %arg5[%c3, %c0_21, %c0_22] : memref<9x8x16xbf16, #tpu.memory_space<vmem>>, vector<1x8x16xbf16>
    %24 = vector.shape_cast %23 : vector<1x8x16xbf16> to vector<8x16xbf16>
    %cst_23 = arith.constant dense<0.000000e+00> : vector<8x16xf32>
    %25 = tpu.matmul %22, %24, %cst_23 {dimension_numbers = #tpu.dot_dimension_numbers<[1], [0], [0], [1], [0, 0, 1, 1], [], []>} : vector<8x8xbf16>, vector<8x16xbf16>, vector<8x16xf32> -> vector<8x16xf32>
    %26 = arith.addf %21, %25 : vector<8x16xf32>
    %27 = vector.extract_strided_slice %3 {offsets = [1, 0], sizes = [8, 8], strides = [1, 1]} : vector<10x8xbf16> to vector<8x8xbf16>
    %c4 = arith.constant 4 : index
    %c0_24 = arith.constant 0 : index
    %c0_25 = arith.constant 0 : index
    %28 = vector.load %arg5[%c4, %c0_24, %c0_25] : memref<9x8x16xbf16, #tpu.memory_space<vmem>>, vector<1x8x16xbf16>
    %29 = vector.shape_cast %28 : vector<1x8x16xbf16> to vector<8x16xbf16>
    %cst_26 = arith.constant dense<0.000000e+00> : vector<8x16xf32>
    %30 = tpu.matmul %27, %29, %cst_26 {dimension_numbers = #tpu.dot_dimension_numbers<[1], [0], [0], [1], [0, 0, 1, 1], [], []>} : vector<8x8xbf16>, vector<8x16xbf16>, vector<8x16xf32> -> vector<8x16xf32>
    %31 = arith.addf %26, %30 : vector<8x16xf32>
    %32 = vector.extract_strided_slice %3 {offsets = [2, 0], sizes = [8, 8], strides = [1, 1]} : vector<10x8xbf16> to vector<8x8xbf16>
    %c5 = arith.constant 5 : index
    %c0_27 = arith.constant 0 : index
    %c0_28 = arith.constant 0 : index
    %33 = vector.load %arg5[%c5, %c0_27, %c0_28] : memref<9x8x16xbf16, #tpu.memory_space<vmem>>, vector<1x8x16xbf16>
    %34 = vector.shape_cast %33 : vector<1x8x16xbf16> to vector<8x16xbf16>
    %cst_29 = arith.constant dense<0.000000e+00> : vector<8x16xf32>
    %35 = tpu.matmul %32, %34, %cst_29 {dimension_numbers = #tpu.dot_dimension_numbers<[1], [0], [0], [1], [0, 0, 1, 1], [], []>} : vector<8x8xbf16>, vector<8x16xbf16>, vector<8x16xf32> -> vector<8x16xf32>
    %36 = arith.addf %31, %35 : vector<8x16xf32>
    %37 = vector.extract_strided_slice %5 {offsets = [0, 0], sizes = [8, 8], strides = [1, 1]} : vector<10x8xbf16> to vector<8x8xbf16>
    %c6 = arith.constant 6 : index
    %c0_30 = arith.constant 0 : index
    %c0_31 = arith.constant 0 : index
    %38 = vector.load %arg5[%c6, %c0_30, %c0_31] : memref<9x8x16xbf16, #tpu.memory_space<vmem>>, vector<1x8x16xbf16>
    %39 = vector.shape_cast %38 : vector<1x8x16xbf16> to vector<8x16xbf16>
    %cst_32 = arith.constant dense<0.000000e+00> : vector<8x16xf32>
    %40 = tpu.matmul %37, %39, %cst_32 {dimension_numbers = #tpu.dot_dimension_numbers<[1], [0], [0], [1], [0, 0, 1, 1], [], []>} : vector<8x8xbf16>, vector<8x16xbf16>, vector<8x16xf32> -> vector<8x16xf32>
    %41 = arith.addf %36, %40 : vector<8x16xf32>
    %42 = vector.extract_strided_slice %5 {offsets = [1, 0], sizes = [8, 8], strides = [1, 1]} : vector<10x8xbf16> to vector<8x8xbf16>
    %c7 = arith.constant 7 : index
    %c0_33 = arith.constant 0 : index
    %c0_34 = arith.constant 0 : index
    %43 = vector.load %arg5[%c7, %c0_33, %c0_34] : memref<9x8x16xbf16, #tpu.memory_space<vmem>>, vector<1x8x16xbf16>
    %44 = vector.shape_cast %43 : vector<1x8x16xbf16> to vector<8x16xbf16>
    %cst_35 = arith.constant dense<0.000000e+00> : vector<8x16xf32>
    %45 = tpu.matmul %42, %44, %cst_35 {dimension_numbers = #tpu.dot_dimension_numbers<[1], [0], [0], [1], [0, 0, 1, 1], [], []>} : vector<8x8xbf16>, vector<8x16xbf16>, vector<8x16xf32> -> vector<8x16xf32>
    %46 = arith.addf %41, %45 : vector<8x16xf32>
    %47 = vector.extract_strided_slice %5 {offsets = [2, 0], sizes = [8, 8], strides = [1, 1]} : vector<10x8xbf16> to vector<8x8xbf16>
    %c8 = arith.constant 8 : index
    %c0_36 = arith.constant 0 : index
    %c0_37 = arith.constant 0 : index
    %48 = vector.load %arg5[%c8, %c0_36, %c0_37] : memref<9x8x16xbf16, #tpu.memory_space<vmem>>, vector<1x8x16xbf16>
    %49 = vector.shape_cast %48 : vector<1x8x16xbf16> to vector<8x16xbf16>
    %cst_38 = arith.constant dense<0.000000e+00> : vector<8x16xf32>
    %50 = tpu.matmul %47, %49, %cst_38 {dimension_numbers = #tpu.dot_dimension_numbers<[1], [0], [0], [1], [0, 0, 1, 1], [], []>} : vector<8x8xbf16>, vector<8x16xbf16>, vector<8x16xf32> -> vector<8x16xf32>
    %51 = arith.addf %46, %50 : vector<8x16xf32>
    %c0_39 = arith.constant 0 : index
    %c0_40 = arith.constant 0 : index
    %52 = vector.load %arg6[%c0_39, %c0_40] : memref<1x16xf32, #tpu.memory_space<vmem>>, vector<1x16xf32>
    %53 = vector.broadcast %52 : vector<1x16xf32> to vector<8x16xf32>
    %54 = arith.addf %51, %53 : vector<8x16xf32>
    %cst_41 = arith.constant 0.000000e+00 : f32
    %55 = vector.broadcast %cst_41 : f32 to vector<8x16xf32>
    %56 = arith.cmpf oge, %54, %55 : vector<8x16xf32>
    %cst_42 = arith.constant 1.000000e-01 : f32
    %57 = vector.broadcast %cst_42 : f32 to vector<8x16xf32>
    %58 = arith.mulf %57, %54 : vector<8x16xf32>
    %59 = arith.select %56, %54, %58 : vector<8x16xi1>, vector<8x16xf32>
    %60 = arith.truncf %59 : vector<8x16xf32> to vector<8x16xbf16>
    %c0_43 = arith.constant 0 : index
    %c0_44 = arith.constant 0 : index
    %c0_45 = arith.constant 0 : index
    %c0_46 = arith.constant 0 : index
    %61 = vector.load %arg7[%c0_43, %c0_44, %c0_45, %c0_46] : memref<1x1x8x16xbf16, #tpu.memory_space<vmem>>, vector<1x1x8x16xbf16>
    %62 = vector.shape_cast %61 : vector<1x1x8x16xbf16> to vector<8x16xbf16>
    %63 = vector.shape_cast %60 : vector<8x16xbf16> to vector<1x1x8x16xbf16>
    tpu.vector_store %arg7[%c0_43, %c0_44, %c0_45, %c0_46], %63 {strides = array<i32>} : memref<1x1x8x16xbf16, #tpu.memory_space<vmem>>, vector<1x1x8x16xbf16>,
    return
  }
  func.func @transform_0(%arg0: i32, %arg1: i32) -> (i32, i32, i32, i32) {
    %c0_i32 = arith.constant 0 : i32
    %0 = arith.addi %arg1, %c0_i32 : i32
    %c0_i32_0 = arith.constant 0 : i32
    %c0_i32_1 = arith.constant 0 : i32
    %c0_i32_2 = arith.constant 0 : i32
    return %arg0, %0, %c0_i32_0, %c0_i32_1 : i32, i32, i32, i32
  }
  func.func @transform_1(%arg0: i32, %arg1: i32) -> (i32, i32, i32, i32) {
    %c1_i32 = arith.constant 1 : i32
    %0 = arith.addi %arg1, %c1_i32 : i32
    %c0_i32 = arith.constant 0 : i32
    %c0_i32_0 = arith.constant 0 : i32
    %c0_i32_1 = arith.constant 0 : i32
    return %arg0, %0, %c0_i32, %c0_i32_0 : i32, i32, i32, i32
  }
  func.func @transform_2(%arg0: i32, %arg1: i32) -> (i32, i32, i32, i32) {
    %c2_i32 = arith.constant 2 : i32
    %0 = arith.addi %arg1, %c2_i32 : i32
    %c0_i32 = arith.constant 0 : i32
    %c0_i32_0 = arith.constant 0 : i32
    %c0_i32_1 = arith.constant 0 : i32
    return %arg0, %0, %c0_i32, %c0_i32_0 : i32, i32, i32, i32
  }
  func.func @transform_3(%arg0: i32, %arg1: i32) -> (i32, i32, i32) {
    %c0_i32 = arith.constant 0 : i32
    %c0_i32_0 = arith.constant 0 : i32
    %c0_i32_1 = arith.constant 0 : i32
    %c0_i32_2 = arith.constant 0 : i32
    return %c0_i32, %c0_i32_0, %c0_i32_1 : i32, i32, i32
  }
  func.func @transform_4(%arg0: i32, %arg1: i32) -> (i32, i32) {
    %c0_i32 = arith.constant 0 : i32
    %c0_i32_0 = arith.constant 0 : i32
    %c0_i32_1 = arith.constant 0 : i32
    return %c0_i32, %c0_i32_0 : i32, i32
  }
  func.func @transform_5(%arg0: i32, %arg1: i32) -> (i32, i32, i32, i32) {
    %c0_i32 = arith.constant 0 : i32
    %c0_i32_0 = arith.constant 0 : i32
    %c0_i32_1 = arith.constant 0 : i32
    return %arg0, %arg1, %c0_i32, %c0_i32_0 : i32, i32, i32, i32
  }
}

module attributes {stable_mosaic.version = 11 : i64} {
  func.func @_fused_conv_mm_kernel(%arg0: i32, %arg1: memref<32x256xbf16, #tpu.memory_space<vmem>>, %arg2: memref<256x16xbf16, #tpu.memory_space<vmem>>, %arg3: memref<1x16xf32, #tpu.memory_space<vmem>>, %arg4: memref<32x16xbf16, #tpu.memory_space<vmem>>) attributes {dimension_semantics = [#tpu.dimension_semantics<parallel>], iteration_bounds = array<i64: 1>, scalar_prefetch = 0 : i64, scratch_operands = 0 : i64, tpu.core_type = #tpu.core_type<tc>, window_params = [{transform_indices = @transform_0, window_bounds = array<i64: 32, 256>}, {pipeline_mode = #tpu.pipeline_mode<synchronous>, transform_indices = @transform_1, window_bounds = array<i64: 256, 16>}, {pipeline_mode = #tpu.pipeline_mode<synchronous>, transform_indices = @transform_2, window_bounds = array<i64: 1, 16>}, {transform_indices = @transform_3, window_bounds = array<i64: 32, 16>}]} {
    %c0 = arith.constant 0 : index
    %c0_0 = arith.constant 0 : index
    %0 = vector.load %arg1[%c0, %c0_0] : memref<32x256xbf16, #tpu.memory_space<vmem>>, vector<32x256xbf16>
    %c0_1 = arith.constant 0 : index
    %c0_2 = arith.constant 0 : index
    %1 = vector.load %arg2[%c0_1, %c0_2] : memref<256x16xbf16, #tpu.memory_space<vmem>>, vector<256x16xbf16>
    %cst = arith.constant dense<0.000000e+00> : vector<32x16xf32>
    %2 = tpu.matmul %0, %1, %cst {dimension_numbers = #tpu.dot_dimension_numbers<[1], [0], [0], [1], [0, 0, 1, 1], [], []>} : vector<32x256xbf16>, vector<256x16xbf16>, vector<32x16xf32> -> vector<32x16xf32>
    %c0_3 = arith.constant 0 : index
    %c0_4 = arith.constant 0 : index
    %3 = vector.load %arg3[%c0_3, %c0_4] : memref<1x16xf32, #tpu.memory_space<vmem>>, vector<1x16xf32>
    %4 = vector.broadcast %3 : vector<1x16xf32> to vector<32x16xf32>
    %5 = arith.addf %2, %4 : vector<32x16xf32>
    %cst_5 = arith.constant 0.000000e+00 : f32
    %6 = vector.broadcast %cst_5 : f32 to vector<32x16xf32>
    %7 = arith.cmpf oge, %5, %6 : vector<32x16xf32>
    %cst_6 = arith.constant 1.000000e-01 : f32
    %8 = vector.broadcast %cst_6 : f32 to vector<32x16xf32>
    %9 = arith.mulf %8, %5 : vector<32x16xf32>
    %10 = arith.select %7, %5, %9 : vector<32x16xi1>, vector<32x16xf32>
    %11 = arith.truncf %10 : vector<32x16xf32> to vector<32x16xbf16>
    %c0_7 = arith.constant 0 : index
    %c0_8 = arith.constant 0 : index
    %12 = vector.load %arg4[%c0_7, %c0_8] : memref<32x16xbf16, #tpu.memory_space<vmem>>, vector<32x16xbf16>
    tpu.vector_store %arg4[%c0_7, %c0_8], %11 {strides = array<i32>} : memref<32x16xbf16, #tpu.memory_space<vmem>>, vector<32x16xbf16>,
    return
  }
  func.func @transform_0(%arg0: i32) -> (i32, i32) {
    %c0_i32 = arith.constant 0 : i32
    %c0_i32_0 = arith.constant 0 : i32
    return %arg0, %c0_i32 : i32, i32
  }
  func.func @transform_1(%arg0: i32) -> (i32, i32) {
    %c0_i32 = arith.constant 0 : i32
    %c0_i32_0 = arith.constant 0 : i32
    %c0_i32_1 = arith.constant 0 : i32
    return %c0_i32, %c0_i32_0 : i32, i32
  }
  func.func @transform_2(%arg0: i32) -> (i32, i32) {
    %c0_i32 = arith.constant 0 : i32
    %c0_i32_0 = arith.constant 0 : i32
    %c0_i32_1 = arith.constant 0 : i32
    return %c0_i32, %c0_i32_0 : i32, i32
  }
  func.func @transform_3(%arg0: i32) -> (i32, i32) {
    %c0_i32 = arith.constant 0 : i32
    %c0_i32_0 = arith.constant 0 : i32
    return %arg0, %c0_i32 : i32, i32
  }
}

module attributes {stable_mosaic.version = 11 : i64} {
  func.func @_conv3x3_row_kernel(%arg0: i32, %arg1: i32, %arg2: memref<1x1x6x16xbf16, #tpu.memory_space<vmem>>, %arg3: memref<1x1x6x16xbf16, #tpu.memory_space<vmem>>, %arg4: memref<1x1x6x16xbf16, #tpu.memory_space<vmem>>, %arg5: memref<9x16x32xbf16, #tpu.memory_space<vmem>>, %arg6: memref<1x32xf32, #tpu.memory_space<vmem>>, %arg7: memref<1x1x4x32xbf16, #tpu.memory_space<vmem>>) attributes {dimension_semantics = [#tpu.dimension_semantics<parallel>, #tpu.dimension_semantics<parallel>], iteration_bounds = array<i64: 2, 4>, scalar_prefetch = 0 : i64, scratch_operands = 0 : i64, tpu.core_type = #tpu.core_type<tc>, window_params = [{transform_indices = @transform_0, window_bounds = array<i64: 1, 1, 6, 16>}, {transform_indices = @transform_1, window_bounds = array<i64: 1, 1, 6, 16>}, {transform_indices = @transform_2, window_bounds = array<i64: 1, 1, 6, 16>}, {pipeline_mode = #tpu.pipeline_mode<synchronous>, transform_indices = @transform_3, window_bounds = array<i64: 9, 16, 32>}, {pipeline_mode = #tpu.pipeline_mode<synchronous>, transform_indices = @transform_4, window_bounds = array<i64: 1, 32>}, {transform_indices = @transform_5, window_bounds = array<i64: 1, 1, 4, 32>}]} {
    %c0 = arith.constant 0 : index
    %c0_0 = arith.constant 0 : index
    %c0_1 = arith.constant 0 : index
    %c0_2 = arith.constant 0 : index
    %0 = vector.load %arg2[%c0, %c0_0, %c0_1, %c0_2] : memref<1x1x6x16xbf16, #tpu.memory_space<vmem>>, vector<1x1x6x16xbf16>
    %1 = vector.shape_cast %0 : vector<1x1x6x16xbf16> to vector<6x16xbf16>
    %c0_3 = arith.constant 0 : index
    %c0_4 = arith.constant 0 : index
    %c0_5 = arith.constant 0 : index
    %c0_6 = arith.constant 0 : index
    %2 = vector.load %arg3[%c0_3, %c0_4, %c0_5, %c0_6] : memref<1x1x6x16xbf16, #tpu.memory_space<vmem>>, vector<1x1x6x16xbf16>
    %3 = vector.shape_cast %2 : vector<1x1x6x16xbf16> to vector<6x16xbf16>
    %c0_7 = arith.constant 0 : index
    %c0_8 = arith.constant 0 : index
    %c0_9 = arith.constant 0 : index
    %c0_10 = arith.constant 0 : index
    %4 = vector.load %arg4[%c0_7, %c0_8, %c0_9, %c0_10] : memref<1x1x6x16xbf16, #tpu.memory_space<vmem>>, vector<1x1x6x16xbf16>
    %5 = vector.shape_cast %4 : vector<1x1x6x16xbf16> to vector<6x16xbf16>
    %cst = arith.constant 0.000000e+00 : f32
    %6 = vector.broadcast %cst : f32 to vector<4x32xf32>
    %7 = vector.extract_strided_slice %1 {offsets = [0, 0], sizes = [4, 16], strides = [1, 1]} : vector<6x16xbf16> to vector<4x16xbf16>
    %c0_11 = arith.constant 0 : index
    %c0_12 = arith.constant 0 : index
    %c0_13 = arith.constant 0 : index
    %8 = vector.load %arg5[%c0_11, %c0_12, %c0_13] : memref<9x16x32xbf16, #tpu.memory_space<vmem>>, vector<1x16x32xbf16>
    %9 = vector.shape_cast %8 : vector<1x16x32xbf16> to vector<16x32xbf16>
    %cst_14 = arith.constant dense<0.000000e+00> : vector<4x32xf32>
    %10 = tpu.matmul %7, %9, %cst_14 {dimension_numbers = #tpu.dot_dimension_numbers<[1], [0], [0], [1], [0, 0, 1, 1], [], []>} : vector<4x16xbf16>, vector<16x32xbf16>, vector<4x32xf32> -> vector<4x32xf32>
    %11 = arith.addf %6, %10 : vector<4x32xf32>
    %12 = vector.extract_strided_slice %1 {offsets = [1, 0], sizes = [4, 16], strides = [1, 1]} : vector<6x16xbf16> to vector<4x16xbf16>
    %c1 = arith.constant 1 : index
    %c0_15 = arith.constant 0 : index
    %c0_16 = arith.constant 0 : index
    %13 = vector.load %arg5[%c1, %c0_15, %c0_16] : memref<9x16x32xbf16, #tpu.memory_space<vmem>>, vector<1x16x32xbf16>
    %14 = vector.shape_cast %13 : vector<1x16x32xbf16> to vector<16x32xbf16>
    %cst_17 = arith.constant dense<0.000000e+00> : vector<4x32xf32>
    %15 = tpu.matmul %12, %14, %cst_17 {dimension_numbers = #tpu.dot_dimension_numbers<[1], [0], [0], [1], [0, 0, 1, 1], [], []>} : vector<4x16xbf16>, vector<16x32xbf16>, vector<4x32xf32> -> vector<4x32xf32>
    %16 = arith.addf %11, %15 : vector<4x32xf32>
    %17 = vector.extract_strided_slice %1 {offsets = [2, 0], sizes = [4, 16], strides = [1, 1]} : vector<6x16xbf16> to vector<4x16xbf16>
    %c2 = arith.constant 2 : index
    %c0_18 = arith.constant 0 : index
    %c0_19 = arith.constant 0 : index
    %18 = vector.load %arg5[%c2, %c0_18, %c0_19] : memref<9x16x32xbf16, #tpu.memory_space<vmem>>, vector<1x16x32xbf16>
    %19 = vector.shape_cast %18 : vector<1x16x32xbf16> to vector<16x32xbf16>
    %cst_20 = arith.constant dense<0.000000e+00> : vector<4x32xf32>
    %20 = tpu.matmul %17, %19, %cst_20 {dimension_numbers = #tpu.dot_dimension_numbers<[1], [0], [0], [1], [0, 0, 1, 1], [], []>} : vector<4x16xbf16>, vector<16x32xbf16>, vector<4x32xf32> -> vector<4x32xf32>
    %21 = arith.addf %16, %20 : vector<4x32xf32>
    %22 = vector.extract_strided_slice %3 {offsets = [0, 0], sizes = [4, 16], strides = [1, 1]} : vector<6x16xbf16> to vector<4x16xbf16>
    %c3 = arith.constant 3 : index
    %c0_21 = arith.constant 0 : index
    %c0_22 = arith.constant 0 : index
    %23 = vector.load %arg5[%c3, %c0_21, %c0_22] : memref<9x16x32xbf16, #tpu.memory_space<vmem>>, vector<1x16x32xbf16>
    %24 = vector.shape_cast %23 : vector<1x16x32xbf16> to vector<16x32xbf16>
    %cst_23 = arith.constant dense<0.000000e+00> : vector<4x32xf32>
    %25 = tpu.matmul %22, %24, %cst_23 {dimension_numbers = #tpu.dot_dimension_numbers<[1], [0], [0], [1], [0, 0, 1, 1], [], []>} : vector<4x16xbf16>, vector<16x32xbf16>, vector<4x32xf32> -> vector<4x32xf32>
    %26 = arith.addf %21, %25 : vector<4x32xf32>
    %27 = vector.extract_strided_slice %3 {offsets = [1, 0], sizes = [4, 16], strides = [1, 1]} : vector<6x16xbf16> to vector<4x16xbf16>
    %c4 = arith.constant 4 : index
    %c0_24 = arith.constant 0 : index
    %c0_25 = arith.constant 0 : index
    %28 = vector.load %arg5[%c4, %c0_24, %c0_25] : memref<9x16x32xbf16, #tpu.memory_space<vmem>>, vector<1x16x32xbf16>
    %29 = vector.shape_cast %28 : vector<1x16x32xbf16> to vector<16x32xbf16>
    %cst_26 = arith.constant dense<0.000000e+00> : vector<4x32xf32>
    %30 = tpu.matmul %27, %29, %cst_26 {dimension_numbers = #tpu.dot_dimension_numbers<[1], [0], [0], [1], [0, 0, 1, 1], [], []>} : vector<4x16xbf16>, vector<16x32xbf16>, vector<4x32xf32> -> vector<4x32xf32>
    %31 = arith.addf %26, %30 : vector<4x32xf32>
    %32 = vector.extract_strided_slice %3 {offsets = [2, 0], sizes = [4, 16], strides = [1, 1]} : vector<6x16xbf16> to vector<4x16xbf16>
    %c5 = arith.constant 5 : index
    %c0_27 = arith.constant 0 : index
    %c0_28 = arith.constant 0 : index
    %33 = vector.load %arg5[%c5, %c0_27, %c0_28] : memref<9x16x32xbf16, #tpu.memory_space<vmem>>, vector<1x16x32xbf16>
    %34 = vector.shape_cast %33 : vector<1x16x32xbf16> to vector<16x32xbf16>
    %cst_29 = arith.constant dense<0.000000e+00> : vector<4x32xf32>
    %35 = tpu.matmul %32, %34, %cst_29 {dimension_numbers = #tpu.dot_dimension_numbers<[1], [0], [0], [1], [0, 0, 1, 1], [], []>} : vector<4x16xbf16>, vector<16x32xbf16>, vector<4x32xf32> -> vector<4x32xf32>
    %36 = arith.addf %31, %35 : vector<4x32xf32>
    %37 = vector.extract_strided_slice %5 {offsets = [0, 0], sizes = [4, 16], strides = [1, 1]} : vector<6x16xbf16> to vector<4x16xbf16>
    %c6 = arith.constant 6 : index
    %c0_30 = arith.constant 0 : index
    %c0_31 = arith.constant 0 : index
    %38 = vector.load %arg5[%c6, %c0_30, %c0_31] : memref<9x16x32xbf16, #tpu.memory_space<vmem>>, vector<1x16x32xbf16>
    %39 = vector.shape_cast %38 : vector<1x16x32xbf16> to vector<16x32xbf16>
    %cst_32 = arith.constant dense<0.000000e+00> : vector<4x32xf32>
    %40 = tpu.matmul %37, %39, %cst_32 {dimension_numbers = #tpu.dot_dimension_numbers<[1], [0], [0], [1], [0, 0, 1, 1], [], []>} : vector<4x16xbf16>, vector<16x32xbf16>, vector<4x32xf32> -> vector<4x32xf32>
    %41 = arith.addf %36, %40 : vector<4x32xf32>
    %42 = vector.extract_strided_slice %5 {offsets = [1, 0], sizes = [4, 16], strides = [1, 1]} : vector<6x16xbf16> to vector<4x16xbf16>
    %c7 = arith.constant 7 : index
    %c0_33 = arith.constant 0 : index
    %c0_34 = arith.constant 0 : index
    %43 = vector.load %arg5[%c7, %c0_33, %c0_34] : memref<9x16x32xbf16, #tpu.memory_space<vmem>>, vector<1x16x32xbf16>
    %44 = vector.shape_cast %43 : vector<1x16x32xbf16> to vector<16x32xbf16>
    %cst_35 = arith.constant dense<0.000000e+00> : vector<4x32xf32>
    %45 = tpu.matmul %42, %44, %cst_35 {dimension_numbers = #tpu.dot_dimension_numbers<[1], [0], [0], [1], [0, 0, 1, 1], [], []>} : vector<4x16xbf16>, vector<16x32xbf16>, vector<4x32xf32> -> vector<4x32xf32>
    %46 = arith.addf %41, %45 : vector<4x32xf32>
    %47 = vector.extract_strided_slice %5 {offsets = [2, 0], sizes = [4, 16], strides = [1, 1]} : vector<6x16xbf16> to vector<4x16xbf16>
    %c8 = arith.constant 8 : index
    %c0_36 = arith.constant 0 : index
    %c0_37 = arith.constant 0 : index
    %48 = vector.load %arg5[%c8, %c0_36, %c0_37] : memref<9x16x32xbf16, #tpu.memory_space<vmem>>, vector<1x16x32xbf16>
    %49 = vector.shape_cast %48 : vector<1x16x32xbf16> to vector<16x32xbf16>
    %cst_38 = arith.constant dense<0.000000e+00> : vector<4x32xf32>
    %50 = tpu.matmul %47, %49, %cst_38 {dimension_numbers = #tpu.dot_dimension_numbers<[1], [0], [0], [1], [0, 0, 1, 1], [], []>} : vector<4x16xbf16>, vector<16x32xbf16>, vector<4x32xf32> -> vector<4x32xf32>
    %51 = arith.addf %46, %50 : vector<4x32xf32>
    %c0_39 = arith.constant 0 : index
    %c0_40 = arith.constant 0 : index
    %52 = vector.load %arg6[%c0_39, %c0_40] : memref<1x32xf32, #tpu.memory_space<vmem>>, vector<1x32xf32>
    %53 = vector.broadcast %52 : vector<1x32xf32> to vector<4x32xf32>
    %54 = arith.addf %51, %53 : vector<4x32xf32>
    %cst_41 = arith.constant 0.000000e+00 : f32
    %55 = vector.broadcast %cst_41 : f32 to vector<4x32xf32>
    %56 = arith.cmpf oge, %54, %55 : vector<4x32xf32>
    %cst_42 = arith.constant 1.000000e-01 : f32
    %57 = vector.broadcast %cst_42 : f32 to vector<4x32xf32>
    %58 = arith.mulf %57, %54 : vector<4x32xf32>
    %59 = arith.select %56, %54, %58 : vector<4x32xi1>, vector<4x32xf32>
    %60 = arith.truncf %59 : vector<4x32xf32> to vector<4x32xbf16>
    %c0_43 = arith.constant 0 : index
    %c0_44 = arith.constant 0 : index
    %c0_45 = arith.constant 0 : index
    %c0_46 = arith.constant 0 : index
    %61 = vector.load %arg7[%c0_43, %c0_44, %c0_45, %c0_46] : memref<1x1x4x32xbf16, #tpu.memory_space<vmem>>, vector<1x1x4x32xbf16>
    %62 = vector.shape_cast %61 : vector<1x1x4x32xbf16> to vector<4x32xbf16>
    %63 = vector.shape_cast %60 : vector<4x32xbf16> to vector<1x1x4x32xbf16>
    tpu.vector_store %arg7[%c0_43, %c0_44, %c0_45, %c0_46], %63 {strides = array<i32>} : memref<1x1x4x32xbf16, #tpu.memory_space<vmem>>, vector<1x1x4x32xbf16>,
    return
  }
  func.func @transform_0(%arg0: i32, %arg1: i32) -> (i32, i32, i32, i32) {
    %c0_i32 = arith.constant 0 : i32
    %0 = arith.addi %arg1, %c0_i32 : i32
    %c0_i32_0 = arith.constant 0 : i32
    %c0_i32_1 = arith.constant 0 : i32
    %c0_i32_2 = arith.constant 0 : i32
    return %arg0, %0, %c0_i32_0, %c0_i32_1 : i32, i32, i32, i32
  }
  func.func @transform_1(%arg0: i32, %arg1: i32) -> (i32, i32, i32, i32) {
    %c1_i32 = arith.constant 1 : i32
    %0 = arith.addi %arg1, %c1_i32 : i32
    %c0_i32 = arith.constant 0 : i32
    %c0_i32_0 = arith.constant 0 : i32
    %c0_i32_1 = arith.constant 0 : i32
    return %arg0, %0, %c0_i32, %c0_i32_0 : i32, i32, i32, i32
  }
  func.func @transform_2(%arg0: i32, %arg1: i32) -> (i32, i32, i32, i32) {
    %c2_i32 = arith.constant 2 : i32
    %0 = arith.addi %arg1, %c2_i32 : i32
    %c0_i32 = arith.constant 0 : i32
    %c0_i32_0 = arith.constant 0 : i32
    %c0_i32_1 = arith.constant 0 : i32
    return %arg0, %0, %c0_i32, %c0_i32_0 : i32, i32, i32, i32
  }
  func.func @transform_3(%arg0: i32, %arg1: i32) -> (i32, i32, i32) {
    %c0_i32 = arith.constant 0 : i32
    %c0_i32_0 = arith.constant 0 : i32
    %c0_i32_1 = arith.constant 0 : i32
    %c0_i32_2 = arith.constant 0 : i32
    return %c0_i32, %c0_i32_0, %c0_i32_1 : i32, i32, i32
  }
  func.func @transform_4(%arg0: i32, %arg1: i32) -> (i32, i32) {
    %c0_i32 = arith.constant 0 : i32
    %c0_i32_0 = arith.constant 0 : i32
    %c0_i32_1 = arith.constant 0 : i32
    return %c0_i32, %c0_i32_0 : i32, i32
  }
  func.func @transform_5(%arg0: i32, %arg1: i32) -> (i32, i32, i32, i32) {
    %c0_i32 = arith.constant 0 : i32
    %c0_i32_0 = arith.constant 0 : i32
    %c0_i32_1 = arith.constant 0 : i32
    return %arg0, %arg1, %c0_i32, %c0_i32_0 : i32, i32, i32, i32
  }
}

module attributes {stable_mosaic.version = 11 : i64} {
  func.func @_fused_conv_mm_kernel(%arg0: i32, %arg1: memref<8x512xbf16, #tpu.memory_space<vmem>>, %arg2: memref<512x32xbf16, #tpu.memory_space<vmem>>, %arg3: memref<1x32xf32, #tpu.memory_space<vmem>>, %arg4: memref<8x32xbf16, #tpu.memory_space<vmem>>) attributes {dimension_semantics = [#tpu.dimension_semantics<parallel>], iteration_bounds = array<i64: 1>, scalar_prefetch = 0 : i64, scratch_operands = 0 : i64, tpu.core_type = #tpu.core_type<tc>, window_params = [{transform_indices = @transform_0, window_bounds = array<i64: 8, 512>}, {pipeline_mode = #tpu.pipeline_mode<synchronous>, transform_indices = @transform_1, window_bounds = array<i64: 512, 32>}, {pipeline_mode = #tpu.pipeline_mode<synchronous>, transform_indices = @transform_2, window_bounds = array<i64: 1, 32>}, {transform_indices = @transform_3, window_bounds = array<i64: 8, 32>}]} {
    %c0 = arith.constant 0 : index
    %c0_0 = arith.constant 0 : index
    %0 = vector.load %arg1[%c0, %c0_0] : memref<8x512xbf16, #tpu.memory_space<vmem>>, vector<8x512xbf16>
    %c0_1 = arith.constant 0 : index
    %c0_2 = arith.constant 0 : index
    %1 = vector.load %arg2[%c0_1, %c0_2] : memref<512x32xbf16, #tpu.memory_space<vmem>>, vector<512x32xbf16>
    %cst = arith.constant dense<0.000000e+00> : vector<8x32xf32>
    %2 = tpu.matmul %0, %1, %cst {dimension_numbers = #tpu.dot_dimension_numbers<[1], [0], [0], [1], [0, 0, 1, 1], [], []>} : vector<8x512xbf16>, vector<512x32xbf16>, vector<8x32xf32> -> vector<8x32xf32>
    %c0_3 = arith.constant 0 : index
    %c0_4 = arith.constant 0 : index
    %3 = vector.load %arg3[%c0_3, %c0_4] : memref<1x32xf32, #tpu.memory_space<vmem>>, vector<1x32xf32>
    %4 = vector.broadcast %3 : vector<1x32xf32> to vector<8x32xf32>
    %5 = arith.addf %2, %4 : vector<8x32xf32>
    %cst_5 = arith.constant 0.000000e+00 : f32
    %6 = vector.broadcast %cst_5 : f32 to vector<8x32xf32>
    %7 = arith.cmpf oge, %5, %6 : vector<8x32xf32>
    %cst_6 = arith.constant 1.000000e-01 : f32
    %8 = vector.broadcast %cst_6 : f32 to vector<8x32xf32>
    %9 = arith.mulf %8, %5 : vector<8x32xf32>
    %10 = arith.select %7, %5, %9 : vector<8x32xi1>, vector<8x32xf32>
    %11 = arith.truncf %10 : vector<8x32xf32> to vector<8x32xbf16>
    %c0_7 = arith.constant 0 : index
    %c0_8 = arith.constant 0 : index
    %12 = vector.load %arg4[%c0_7, %c0_8] : memref<8x32xbf16, #tpu.memory_space<vmem>>, vector<8x32xbf16>
    tpu.vector_store %arg4[%c0_7, %c0_8], %11 {strides = array<i32>} : memref<8x32xbf16, #tpu.memory_space<vmem>>, vector<8x32xbf16>,
    return
  }
  func.func @transform_0(%arg0: i32) -> (i32, i32) {
    %c0_i32 = arith.constant 0 : i32
    %c0_i32_0 = arith.constant 0 : i32
    return %arg0, %c0_i32 : i32, i32
  }
  func.func @transform_1(%arg0: i32) -> (i32, i32) {
    %c0_i32 = arith.constant 0 : i32
    %c0_i32_0 = arith.constant 0 : i32
    %c0_i32_1 = arith.constant 0 : i32
    return %c0_i32, %c0_i32_0 : i32, i32
  }
  func.func @transform_2(%arg0: i32) -> (i32, i32) {
    %c0_i32 = arith.constant 0 : i32
    %c0_i32_0 = arith.constant 0 : i32
    %c0_i32_1 = arith.constant 0 : i32
    return %c0_i32, %c0_i32_0 : i32, i32
  }
  func.func @transform_3(%arg0: i32) -> (i32, i32) {
    %c0_i32 = arith.constant 0 : i32
    %c0_i32_0 = arith.constant 0 : i32
    return %arg0, %c0_i32 : i32, i32
  }
}

module attributes {stable_mosaic.version = 11 : i64} {
  func.func @_global_pool_kernel(%arg0: i32, %arg1: memref<2x4x32xbf16, #tpu.memory_space<vmem>>, %arg2: memref<2x32xf32, #tpu.memory_space<vmem>>) attributes {dimension_semantics = [#tpu.dimension_semantics<arbitrary>], iteration_bounds = array<i64: 1>, scalar_prefetch = 0 : i64, scratch_operands = 0 : i64, tpu.core_type = #tpu.core_type<tc>, window_params = [{transform_indices = @transform_0, window_bounds = array<i64: 2, 4, 32>}, {pipeline_mode = #tpu.pipeline_mode<synchronous>, transform_indices = @transform_1, window_bounds = array<i64: 2, 32>}]} {
    %c0_i32 = arith.constant 0 : i32
    %0 = arith.cmpi eq, %arg0, %c0_i32 : i32
    %1 = arith.extui %0 : i1 to i32
    %c0_i32_0 = arith.constant 0 : i32
    %2 = arith.cmpi ne, %1, %c0_i32_0 : i32
    scf.if %2 {
      %cst_9 = arith.constant 0.000000e+00 : f32
      %12 = vector.broadcast %cst_9 : f32 to vector<2x32xf32>
      %c0_10 = arith.constant 0 : index
      %c0_11 = arith.constant 0 : index
      %13 = vector.load %arg2[%c0_10, %c0_11] : memref<2x32xf32, #tpu.memory_space<vmem>>, vector<2x32xf32>
      tpu.vector_store %arg2[%c0_10, %c0_11], %12 {strides = array<i32>} : memref<2x32xf32, #tpu.memory_space<vmem>>, vector<2x32xf32>,
    } else {
    }
    %c0 = arith.constant 0 : index
    %c0_1 = arith.constant 0 : index
    %3 = vector.load %arg2[%c0, %c0_1] : memref<2x32xf32, #tpu.memory_space<vmem>>, vector<2x32xf32>
    %c0_2 = arith.constant 0 : index
    %c0_3 = arith.constant 0 : index
    %c0_4 = arith.constant 0 : index
    %4 = vector.load %arg1[%c0_2, %c0_3, %c0_4] : memref<2x4x32xbf16, #tpu.memory_space<vmem>>, vector<2x4x32xbf16>
    %5 = arith.extf %4 : vector<2x4x32xbf16> to vector<2x4x32xf32>
    %cst = arith.constant dense<0.000000e+00> : vector<2x32xf32>
    %6 = vector.multi_reduction <add>, %5, %cst [1] : vector<2x4x32xf32> to vector<2x32xf32>
    %7 = arith.addf %3, %6 : vector<2x32xf32>
    %c0_5 = arith.constant 0 : index
    %c0_6 = arith.constant 0 : index
    %8 = vector.load %arg2[%c0_5, %c0_6] : memref<2x32xf32, #tpu.memory_space<vmem>>, vector<2x32xf32>
    tpu.vector_store %arg2[%c0_5, %c0_6], %7 {strides = array<i32>} : memref<2x32xf32, #tpu.memory_space<vmem>>, vector<2x32xf32>,
    %c0_i32_7 = arith.constant 0 : i32
    %9 = arith.cmpi eq, %arg0, %c0_i32_7 : i32
    %10 = arith.extui %9 : i1 to i32
    %c0_i32_8 = arith.constant 0 : i32
    %11 = arith.cmpi ne, %10, %c0_i32_8 : i32
    scf.if %11 {
      %c0_9 = arith.constant 0 : index
      %c0_10 = arith.constant 0 : index
      %12 = vector.load %arg2[%c0_9, %c0_10] : memref<2x32xf32, #tpu.memory_space<vmem>>, vector<2x32xf32>
      %cst_11 = arith.constant 2.500000e-01 : f32
      %13 = vector.broadcast %cst_11 : f32 to vector<2x32xf32>
      %14 = arith.mulf %12, %13 : vector<2x32xf32>
      %c0_12 = arith.constant 0 : index
      %c0_13 = arith.constant 0 : index
      %15 = vector.load %arg2[%c0_12, %c0_13] : memref<2x32xf32, #tpu.memory_space<vmem>>, vector<2x32xf32>
      tpu.vector_store %arg2[%c0_12, %c0_13], %14 {strides = array<i32>} : memref<2x32xf32, #tpu.memory_space<vmem>>, vector<2x32xf32>,
    } else {
    }
    return
  }
  func.func @transform_0(%arg0: i32) -> (i32, i32, i32) {
    %c0_i32 = arith.constant 0 : i32
    %c0_i32_0 = arith.constant 0 : i32
    %c0_i32_1 = arith.constant 0 : i32
    return %c0_i32, %arg0, %c0_i32_0 : i32, i32, i32
  }
  func.func @transform_1(%arg0: i32) -> (i32, i32) {
    %c0_i32 = arith.constant 0 : i32
    %c0_i32_0 = arith.constant 0 : i32
    %c0_i32_1 = arith.constant 0 : i32
    return %c0_i32, %c0_i32_0 : i32, i32
  }
}

</mosaic_0001>

<bundles_post_ra>
// kernel: encoder_forward_pallas.7
= control target key start
LH: loop header
LB: loop body
LE: loop exit
PB: predicated region body
PF: predicated region fallthrough
CT: control target
= control target key end

     0   :  { %s1282_s18 = smov 0   ;;  %s1284_s19 = smov 0   ;;  %s1443_s0 = inlined_call_operand.vmem [shape: bf16[2,18,18,3], index: 0, kind: input, shape index: {}, may-alias: {0,1,2}]   ;;  %s1444_s1 = inlined_call_operand.vmem [shape: bf16[2,18,18,3], index: 1, kind: input, shape index: {}, may-alias: {0,1,2}]   ;;  %s1445_s2 = inlined_call_operand.vmem [shape: bf16[2,18,18,3], index: 2, kind: input, shape index: {}, may-alias: {0,1,2}]   ;;  %s1446_s3 = inlined_call_operand.vmem [shape: bf16[9,3,8], index: 3, kind: input, shape index: {}]   ;;  %s1447_s4 = inlined_call_operand.vmem [shape: f32[1,8], index: 4, kind: input, shape index: {}]   ;;  %s1448_s5 = inlined_call_operand.vmem [shape: bf16[2,16,16,8], index: 5, kind: output, shape index: {}]  }
   0x1   :  { %s1286_s20 = smov 0   ;;  %s1288_s21 = smov 0  }
   0x2   :  { %s1290_s22 = smov 0  }
   0x3 LB: > { %s24_s23 = sadd.s32 1, %s1239_s20  ;;  %s27_s24 = sadd.s32 1, %s1243_s21  ;;  %s1247_s22 = sphi %s1290_s22, %s15_s22   ;;  %s1243_s21 = sphi %s1288_s21, %s1452_s21   ;;  %s1239_s20 = sphi %s1286_s20, %s1451_s20   ;;  %s1235_s19 = sphi %s1284_s19, %s1450_s19   ;;  %s1231_s18 = sphi %s1282_s18, %s1449_s18  }
   0x4   : > { %p25_p0 = scmp.ge.s32.totalorder %s24_s23, 16  ;;  %p1047_p1 = scmp.ge.s32.totalorder %s1247_s22, 1 }
   0x5   : > { %p247_p2 = scmp.lt.s32.totalorder %s1247_s22, 33 }
   0x6   : > { %s1454_s23 = smov (%p25_p0, %s24_s23), 0  ;;  %s1456_s24 = smov (!%p25_p0, %s27_s24), %s1243_s21 }
   0x7   : > { %p248_p3 = pnand %p1047_p1, %p247_p2  ;;  %p29_p4 = scmp.ge.s32.totalorder %s1456_s24, 2 }
   0x8   : > { %v1054_v0 = vld [vmem:[%s1446_s3 + $0x2] sm:$0x3] (!%p248_p3)  ;;  %vm381_vm0 = vcmask (!%p248_p3), 1040384   ;;  %vm382_vm1 = vcmask (!%p248_p3), 1041408   ;;  %v1249_v1 = vmov (!%p248_p3), 0.0   ;;  %v1250_v2 = vmov (!%p248_p3), 65535  }
   0x9   : > { %s1458_s24 = smov (%p29_p4, %s1456_s24), 0  ;;  %251 = sbr.rel (%p248_p3) target bundleno = 288 (0x120), region = 40 }
   0xa   : > { %1102 = vmatprep.subr.bf16.mxu0 (!%p248_p3), %v1249_v1  ;;  %v383_v3 = vsel (!%p248_p3), %vm381_vm0, 4294967295, %v1250_v2  ;;  %1108 = vmatprep.subr.bf16.mxu1 (!%p248_p3), %v1249_v1  ;;  %v353_v4 = vld [vmem:[%s1446_s3] sm:$0x3] (!%p248_p3)  ;;  %p303_p5 = scmp.lt.s32.totalorder (!%p248_p3), %s1235_s19, 1  ;;  %p305_p6 = scmp.lt.s32.totalorder (!%p248_p3), %s1231_s18, 17  ;;  %vm1251_vm2 = vmmov (!%p248_p3), 0  }
   0xb   : > { %v1326_v5 = vsel (!%p248_p3), %vm382_vm1, %v383_v3, 0  ;;  %1104 = vmatprep.mubr.msk.bf16.mxu0 (!%p248_p3), %vm1251_vm2, %v1249_v1  ;;  %1110 = vmatprep.mubr.msk.bf16.mxu1 (!%p248_p3), %vm1251_vm2, %v1249_v1  ;;  %s312_s6 = sadd.s32 (!%p248_p3), 1, %s1231_s18  ;;  %s323_s8 = sadd.s32 (!%p248_p3), 2, %s1231_s18  ;;  %v1061_v8 = vld [vmem:[%s1446_s3 + $0x6] sm:$0x3] (!%p248_p3)  ;;  %vm377_vm3 = vcmask (!%p248_p3), 23552  }
   0xc   : > { %v386_v6 = vand.u32 (!%p248_p3), %v1054_v0, %v1326_v5  ;;  %v432_v7 = vand.u32 (!%p248_p3), %v1326_v5, %v353_v4  ;;  %p315_p7 = scmp.lt.s32.totalorder (!%p248_p3), %s312_s6, 17  ;;  %p326_p8 = scmp.lt.s32.totalorder (!%p248_p3), %s323_s8, 17  ;;  %v541_v9 = vand.u32 (!%p248_p3), %v1061_v8, %v1326_v5  ;;  %v1059_v15 = vld [vmem:[%s1446_s3 + $0x4] sm:$0x3] (!%p248_p3)  ;;  %vm364_vm4 = vsmask.f32 (!%p248_p3), 7424 }
   0xd   : > { %v1067_v18 = vld [vmem:[%s1446_s3 + $0xa] sm:$0x3] (!%p248_p3)  ;;  %v485_v20 = vand.u32 (!%p248_p3), %v1059_v15, %v1326_v5  ;;  %v1064_v23 = vld [vmem:[%s1446_s3 + $0x8] sm:$0x3] (!%p248_p3)  ;;  %vm477_vm5 = vcmask (!%p248_p3), 1046528   ;;  %p336_p9 = scmp.lt.s32.totalorder (!%p248_p3), %s1231_s18, 15 }
   0xe   : > { %1103 = vmatpush3.bf16.msra.mxu0 (!%p248_p3), %v386_v6  ;;  %1109 = vmatpush3.bf16.msra.mxu1 (!%p248_p3), %v432_v7  ;;  %v660_v24 = vand.u32 (!%p248_p3), %v1067_v18, %v1326_v5  ;;  %v1072_v30 = vld [vmem:[%s1446_s3 + $0xe] sm:$0x3] (!%p248_p3)  ;;  %v606_v35 = vand.u32 (!%p248_p3), %v1064_v23, %v1326_v5  ;;  %v1069_v47 = vld [vmem:[%s1446_s3 + $0xc] sm:$0x3] (!%p248_p3)  ;;  %v1075_v53 = vld [vmem:[%s1446_s3 + $0x10] sm:$0x3] (!%p248_p3) }
   0xf   : > { %1114 = vmatprep.subr.bf16.mxu0 (!%p248_p3), %v1249_v1  ;;  %1120 = vmatprep.subr.bf16.mxu1 (!%p248_p3), %v1249_v1  ;;  %v781_v40 = vand.u32 (!%p248_p3), %v1072_v30, %v1326_v5  ;;  %v716_v51 = vand.u32 (!%p248_p3), %v1069_v47, %v1326_v5  ;;  %v835_v54 = vand.u32 (!%p248_p3), %v1075_v53, %v1326_v5  ;;  %vm903_vm7 = vcmask (!%p248_p3), 60416  }
  0x10   : > { %s1460_s19 = smov (!%p303_p5, %s1235_s19), 1  ;;  %s1462_s6 = smov (!%p315_p7, %s312_s6), 17 }
  0x11   : > { %s306_s29 = scalar_select %p305_p6, %s1231_s18, 17 }
  0x12   : > { %s1339_s30 = smul.u32 54, %s1460_s19  ;;  %s1464_s8 = smov (!%p326_p8, %s323_s8), 17 }
  0x13   : > { %s1156_s7 = smul.u32 3, %s306_s29  ;;  %s1466_s18 = smov (!%p336_p9, %s1231_s18), 15 }
  0x14   : > { %s1158_s16 = smul.u32 3, %s1462_s6  ;;  %s1051_s29 = sshll.u32 %s1466_s18, 1 }
  0x15   : > { %s309_s9 = sadd.s32 %s1339_s30, %s1156_s7  ;;  %s1159_s26 = smul.u32 3, %s1464_s8 }
  0x16   : > { %s1048_s12 = sshll.u32 %s309_s9, 2  ;;  %s319_s27 = sadd.s32 %s1158_s16, %s1339_s30 }
  0x17   : > { %s311_s15 = scalar_lea.vmem %s1443_s0, %s1048_s12  ;;  %s1049_s28 = sshll.u32 %s319_s27, 2 }
  0x18   : > { %v1203_v10 = vld [vmem:[%s311_s15] sm:$0xff]   ;;  %v1204_v11 = vld [vmem:[%s311_s15 + $0x8] ss:$0 sps:$4 sm:$0x11]   ;;  %s330_s6 = sadd.s32 %s1159_s26, %s1339_s30  ;;  %s321_s11 = scalar_lea.vmem %s1444_s1, %s1049_s28 }
  0x19   : > { %v366_v12 = vshrl.u32 %v1203_v10, 16  ;;  %v368_v13 = vshll.u32 %v1203_v10, 16  ;;  %v373_v14 = vshll.u32 %v1204_v11, 16  ;;  %1111 = vmatmul.mubr.msk.bf16.vlgmr.msra.gmra.mrb[0].mxu1 %vm377_vm3, %v1203_v10  ;;  %s1050_s8 = sshll.u32 %s330_s6, 2  ;;  %v1205_v21 = vld [vmem:[%s321_s11] sm:$0xff]   ;;  %v478_v26 = vrot.slane %v1203_v10, 1 }
  0x1a   : > { %1121 = vmatpush3.bf16.msra.mxu1 %v541_v9  ;;  %1122 = vmatprep.mubr.msk.bf16.mxu1 %vm1251_vm2, %v1249_v1  ;;  %s332_s14 = scalar_lea.vmem %s1445_s2, %s1050_s8  ;;  %v1206_v27 = vld [vmem:[%s321_s11 + $0x8] ss:$0 sps:$4 sm:$0x11]   ;;  %v479_v28 = vrot.slane %v1204_v11, 1  ;;  %v593_v29 = vshll.u32 %v1205_v21, 16  ;;  %v653_v31 = vrot.slane %v1205_v21, 1 }
  0x1b   : > { %v370_v16 = vrot.slane %v368_v13, 1  ;;  %v375_v17 = vrot.slane %v373_v14, 1  ;;  %1132 = vmatprep.subr.bf16.mxu1 %v1249_v1  ;;  %v1207_v25 = vld [vmem:[%s332_s14] sm:$0xff]   ;;  %v654_v32 = vrot.slane %v1206_v27, 1  ;;  %v591_v37 = vshrl.u32 %v1205_v21, 16  ;;  %s1052_s7 = sshll.u32 %s1460_s19, 5 }
  0x1c   : > { %v1208_v33 = vld [vmem:[%s332_s14 + $0x8] ss:$0 sps:$4 sm:$0x11]   ;;  %v768_v34 = vshll.u32 %v1207_v25, 16  ;;  %v480_v36 = vsel %vm477_vm5, %v478_v26, %v479_v28  ;;  %v595_v38 = vrot.slane %v593_v29, 1  ;;  %v598_v39 = vshll.u32 %v1206_v27, 16  ;;  %s340_s10 = sadd.s32 %s1052_s7, %s1051_s29 }
  0x1d   : > { %v371_v19 = vor.u32 %v370_v16, %v366_v12  ;;  %v655_v41 = vsel %vm477_vm5, %v653_v31, %v654_v32  ;;  %v766_v42 = vshrl.u32 %v1207_v25, 16  ;;  %v773_v44 = vshll.u32 %v1208_v33, 16  ;;  %s1053_s11 = sshll.u32 %s340_s10, 2 }
  0x1e   : > { %v770_v43 = vrot.slane %v768_v34, 1  ;;  %v596_v45 = vor.u32 %v595_v38, %v591_v37  ;;  %v600_v46 = vrot.slane %v598_v39, 1  ;;  %v828_v55 = vrot.slane %v1207_v25, 1  ;;  %s342_s18 = scalar_lea.vmem %s1448_s5, %s1053_s11 }
  0x1f   : > { %v376_v22 = vsel %vm364_vm4, %v371_v19, %v375_v17  ;;  %v775_v49 = vrot.slane %v773_v44, 1  ;;  %v829_v56 = vrot.slane %v1208_v33, 1 }
  0x20   : > { %1105 = vmatmul.mubr.msk.bf16.vlgmr.msra.gmra.mrb[0].mxu0 %vm377_vm3, %v376_v22  ;;  %v771_v48 = vor.u32 %v770_v43, %v766_v42  ;;  %v601_v50 = vsel %vm364_vm4, %v596_v45, %v600_v46 }
  0x21   : > { %1115 = vmatpush3.bf16.msra.mxu0 %v485_v20  ;;  %1116 = vmatprep.mubr.msk.bf16.mxu0 %vm1251_vm2, %v1249_v1  ;;  %v830_v57 = vsel %vm477_vm5, %v828_v55, %v829_v56 }
  0x22   : > { %1126 = vmatprep.subr.bf16.mxu0 %v1249_v1  ;;  %1123 = vmatmul.mubr.msk.bf16.vlgmr.msra.gmra.mrb[4].mxu1 %vm377_vm3, %v1205_v21  ;;  %v776_v52 = vsel %vm364_vm4, %v771_v48, %v775_v49 }
  0x23   : > { %1133 = vmatpush3.bf16.msra.mxu1 %v660_v24  ;;  %1134 = vmatprep.mubr.msk.bf16.mxu1 %vm1251_vm2, %v1249_v1 }
  0x24   : > { %1144 = vmatprep.subr.bf16.mxu1 %v1249_v1 }
  0x28   : > { %1117 = vmatmul.mubr.msk.bf16.vlgmr.msra.gmra.mrb[4].mxu0 %vm377_vm3, %v480_v36 }
  0x29   : > { %1127 = vmatpush3.bf16.msra.mxu0 %v606_v35  ;;  %1128 = vmatprep.mubr.msk.bf16.mxu0 %vm1251_vm2, %v1249_v1 }
  0x2a   : > { %1138 = vmatprep.subr.bf16.mxu0 %v1249_v1  ;;  %1135 = vmatmul.mubr.msk.bf16.vlgmr.msra.gmra.mrb[8].mxu1 %vm377_vm3, %v655_v41  ;;  %v1077_v41 = vld [vmem:[%s1447_s4] ss:$0 sm:$0xff] }
  0x2b   : > { %1145 = vmatpush3.bf16.msra.mxu1 %v781_v40  ;;  %1146 = vmatprep.mubr.msk.bf16.mxu1 %vm1251_vm2, %v1249_v1 }
  0x30   : > { %1129 = vmatmul.mubr.msk.bf16.vlgmr.msra.gmra.mrb[8].mxu0 %vm377_vm3, %v601_v50 }
  0x31   : > { %1139 = vmatpush3.bf16.msra.mxu0 %v716_v51  ;;  %1140 = vmatprep.mubr.msk.bf16.mxu0 %vm1251_vm2, %v1249_v1 }
  0x32   : > { %1150 = vmatprep.subr.bf16.mxu0 %v1249_v1  ;;  %1147 = vmatmul.mubr.msk.bf16.vlgmr.msra.gmra.mrb[12].mxu1 %vm377_vm3, %v776_v52 }
  0x38   : > { %1141 = vmatmul.mubr.msk.bf16.vlgmr.msra.gmra.mrb[12].mxu0 %vm377_vm3, %v1207_v25 }
  0x39   : > { %1151 = vmatpush3.bf16.msra.mxu0 %v835_v54  ;;  %1152 = vmatprep.mubr.msk.bf16.mxu0 %vm1251_vm2, %v1249_v1 }
  0x40   : > { %1153 = vmatmul.mubr.msk.bf16.vlgmr.msra.gmra.mrb[16].mxu0 %vm377_vm3, %v830_v57 }
  0xec   : > { %v468_v58 = vpop.f32.mrb[0].mxu1 }
  0xed   : > { %v1112_v59 = vpop.f32.mrb[1].mxu1 }
  0xee   : > { %v471_v60 = vpop.f32.mrb[2].mxu1 }
  0xef   : > { %v1113_v61 = vpop.f32.mrb[3].mxu1 }
  0xf3   : > { %v422_v62 = vpop.f32.mrb[0].mxu0 }
  0xf4   : > { %v469_v63 = vadd.f32 %v468_v58, %v422_v62  ;;  %v1106_v0 = vpop.f32.mrb[1].mxu0 }
  0xf5   : > { %v425_v2 = vpop.f32.mrb[2].mxu0  ;;  %v577_v3 = vpop.f32.mrb[4].mxu1 }
  0xf6   : > { %v472_v4 = vadd.f32 %v471_v60, %v425_v2  ;;  %v1107_v5 = vpop.f32.mrb[3].mxu0  ;;  %v1124_v6 = vpop.f32.mrb[5].mxu1 }
  0xf7   : > { %v580_v7 = vpop.f32.mrb[6].mxu1 }
  0xf8   : > { %v1125_v1 = vpop.f32.mrb[7].mxu1 }
  0xfb   : > { %v521_v8 = vpop.f32.mrb[4].mxu0 }
  0xfc   : > { %v528_v9 = vadd.f32 %v521_v8, %v469_v63  ;;  %v1118_v10 = vpop.f32.mrb[5].mxu0 }
  0xfd   : > { %v524_v11 = vpop.f32.mrb[6].mxu0  ;;  %v696_v12 = vpop.f32.mrb[8].mxu1 }
  0xfe   : > { %v529_v13 = vadd.f32 %v524_v11, %v472_v4  ;;  %v584_v14 = vadd.f32 %v577_v3, %v528_v9  ;;  %v1119_v15 = vpop.f32.mrb[7].mxu0  ;;  %v1136_v16 = vpop.f32.mrb[9].mxu1 }
  0xff   : > { %v699_v17 = vpop.f32.mrb[10].mxu1 }
 0x100   : > { %v585_v18 = vadd.f32 %v580_v7, %v529_v13  ;;  %v1137_v19 = vpop.f32.mrb[11].mxu1 }
 0x103   : > { %v642_v20 = vpop.f32.mrb[8].mxu0 }
 0x104   : > { %v649_v21 = vadd.f32 %v642_v20, %v584_v14  ;;  %v1130_v22 = vpop.f32.mrb[9].mxu0 }
 0x105   : > { %v645_v23 = vpop.f32.mrb[10].mxu0  ;;  %v817_v24 = vpop.f32.mrb[12].mxu1 }
 0x106   : > { %v650_v25 = vadd.f32 %v645_v23, %v585_v18  ;;  %v703_v26 = vadd.f32 %v696_v12, %v649_v21  ;;  %v1131_v27 = vpop.f32.mrb[11].mxu0  ;;  %v1148_v28 = vpop.f32.mrb[13].mxu1 }
 0x107   : > { %v820_v29 = vpop.f32.mrb[14].mxu1 }
 0x108   : > { %v704_v30 = vadd.f32 %v699_v17, %v650_v25  ;;  %v1149_v31 = vpop.f32.mrb[15].mxu1 }
 0x10b   : > { %v752_v32 = vpop.f32.mrb[12].mxu0 }
 0x10c   : > { %v759_v33 = vadd.f32 %v752_v32, %v703_v26  ;;  %v1142_v34 = vpop.f32.mrb[13].mxu0 }
 0x10d   : > { %v755_v35 = vpop.f32.mrb[14].mxu0 }
 0x10e   : > { %v760_v36 = vadd.f32 %v755_v35, %v704_v30  ;;  %v824_v37 = vadd.f32 %v817_v24, %v759_v33  ;;  %v1143_v38 = vpop.f32.mrb[15].mxu0 }
 0x110   : > { %v825_v39 = vadd.f32 %v820_v29, %v760_v36 }
 0x113   : > { %v871_v40 = vpop.f32.mrb[16].mxu0 }
 0x114   : > { %v878_v42 = vadd.f32 %v871_v40, %v824_v37  ;;  %v1154_v43 = vpop.f32.mrb[17].mxu0 }
 0x115   : > { %v874_v44 = vpop.f32.mrb[18].mxu0 }
 0x116   : > { %v887_v45 = vadd.f32 %v1077_v41, %v878_v42  ;;  %v879_v46 = vadd.f32 %v874_v44, %v825_v39  ;;  %v1155_v47 = vpop.f32.mrb[19].mxu0 }
 0x118   : > { %vm889_vm6 = vcmp.ge.f32.partialorder %v887_v45, 0.0  ;;  %v891_v48 = vmul.f32 0.1, %v887_v45  ;;  %v888_v49 = vadd.f32 %v1077_v41, %v879_v46 }
 0x11a   : > { %v893_v50 = vsel %vm889_vm6, %v887_v45, %v891_v48  ;;  %vm890_vm8 = vcmp.ge.f32.partialorder %v888_v49, 0.0  ;;  %v892_v51 = vmul.f32 0.1, %v888_v49 }
 0x11b   : > { %v1082_v52 = vpack.c.bf16 %v893_v50, %v893_v50 }
 0x11c   : > { %v894_v53 = vsel %vm890_vm8, %v888_v49, %v892_v51 }
 0x11d   : > { %904 = vst.msk [vmem:[%s342_s18] sm:$0xf] %vm903_vm7, %v1082_v52  ;;  %v1083_v54 = vpack.c.bf16 %v894_v53, %v894_v53 }
 0x11f   : > { %905 = vst.msk [vmem:[%s342_s18 + $0x4] sm:$0xf] %vm903_vm7, %v1083_v54 }
 0x120 PF: > { %s15_s22 = sadd.s32 1, %s1247_s22   ;;  %s1449_s18 = smov %s1239_s20 }
 0x121   : > { %p12_p10 = scmp.ge.s32.totalorder %s15_s22, 34   ;;  %s1450_s19 = smov %s1243_s21 }
 0x122   : > { %s1451_s20 = smov %s1454_s23  ;;  %s1452_s21 = smov %s1458_s24 }
 0x123   :  { %14 = sbr.rel (!%p12_p10) target bundleno = 3 (0x3), region = 84 }

// kernel: encoder_forward_pallas.8
= control target key start
LH: loop header
LB: loop body
LE: loop exit
PB: predicated region body
PF: predicated region fallthrough
CT: control target
= control target key end

     0   :  { %vm359_vm0 = vcmask 60416   ;;  %s662_s1 = inlined_call_operand.vmem [shape: bf16[128,8], index: 1, kind: input, shape index: {}]   ;;  %s663_s0 = inlined_call_operand.vmem [shape: bf16[128,128], index: 0, kind: input, shape index: {}]   ;;  %s664_s2 = inlined_call_operand.vmem [shape: f32[1,8], index: 2, kind: input, shape index: {}]   ;;  %s665_s3 = inlined_call_operand.vmem [shape: bf16[128,8], index: 3, kind: output, shape index: {}]  }
   0x1   :  { %v493_v0 = vld [vmem:[%s662_s1] sm:$0xff]   ;;  %v494_v1 = vld [vmem:[%s662_s1 + $0x8] sm:$0xff]   ;;  %v495_v2 = vld [vmem:[%s662_s1 + $0x10] sm:$0xff]  }
   0x2   :  { %445 = vmatprep.subr.bf16.mxu0 %v493_v0  ;;  %477 = vmatprep.subr.bf16.mxu1 %v493_v0  ;;  %v496_v3 = vld [vmem:[%s662_s1 + $0x18] sm:$0xff]   ;;  %v501_v4 = vld [vmem:[%s663_s0] sm:$0xff]   ;;  %v498_v7 = vld [vmem:[%s662_s1 + $0x28] sm:$0xff]  }
   0x3   :  { %446 = vmatpush3.bf16.msra.mxu0 %v493_v0  ;;  %485 = vmatpush3.bf16.msra.mxu1 %v493_v0  ;;  %v502_v5 = vld [vmem:[%s663_s0 + $0x20] sm:$0xff]   ;;  %v499_v8 = vld [vmem:[%s662_s1 + $0x30] sm:$0xff]   ;;  %v500_v9 = vld [vmem:[%s662_s1 + $0x38] sm:$0xff]  }
   0x4   :  { %447 = vmatprep.subr.bf16.mxu0 %v494_v1  ;;  %478 = vmatprep.subr.bf16.mxu1 %v494_v1  ;;  %v497_v6 = vld [vmem:[%s662_s1 + $0x20] sm:$0xff]   ;;  %v503_v10 = vld [vmem:[%s663_s0 + $0x8] sm:$0xff]   ;;  %v505_v12 = vld [vmem:[%s663_s0 + $0x10] sm:$0xff]  }
   0x5   :  { %461 = vmatprep.mubr.bf16.mxu0 %v501_v4  ;;  %469 = vmatprep.mubr.bf16.mxu1 %v502_v5  ;;  %v504_v11 = vld [vmem:[%s663_s0 + $0x28] sm:$0xff]   ;;  %v506_v13 = vld [vmem:[%s663_s0 + $0x30] sm:$0xff]   ;;  %v507_v14 = vld [vmem:[%s663_s0 + $0x18] sm:$0xff]  }
   0x6   :  { %v508_v15 = vld [vmem:[%s663_s0 + $0x38] sm:$0xff]   ;;  %v580_v16 = vld [vmem:[%s664_s2] ss:$0 sm:$0xff] }
   0x7   :  { %448 = vmatpush3.bf16.msra.mxu0 %v494_v1  ;;  %486 = vmatpush3.bf16.msra.mxu1 %v494_v1 }
   0x8   :  { %449 = vmatprep.subr.bf16.mxu0 %v495_v2  ;;  %479 = vmatprep.subr.bf16.mxu1 %v495_v2 }
   0xb   :  { %450 = vmatpush3.bf16.msra.mxu0 %v495_v2  ;;  %487 = vmatpush3.bf16.msra.mxu1 %v495_v2 }
   0xc   :  { %451 = vmatprep.subr.bf16.mxu0 %v496_v3  ;;  %480 = vmatprep.subr.bf16.mxu1 %v496_v3 }
   0xf   :  { %452 = vmatpush3.bf16.msra.mxu0 %v496_v3  ;;  %488 = vmatpush3.bf16.msra.mxu1 %v496_v3 }
  0x10   :  { %453 = vmatprep.subr.bf16.mxu0 %v497_v6  ;;  %481 = vmatprep.subr.bf16.mxu1 %v497_v6 }
  0x13   :  { %454 = vmatpush3.bf16.msra.mxu0 %v497_v6  ;;  %489 = vmatpush3.bf16.msra.mxu1 %v497_v6 }
  0x14   :  { %455 = vmatprep.subr.bf16.mxu0 %v498_v7  ;;  %482 = vmatprep.subr.bf16.mxu1 %v498_v7 }
  0x17   :  { %456 = vmatpush3.bf16.msra.mxu0 %v498_v7  ;;  %490 = vmatpush3.bf16.msra.mxu1 %v498_v7 }
  0x18   :  { %457 = vmatprep.subr.bf16.mxu0 %v499_v8  ;;  %483 = vmatprep.subr.bf16.mxu1 %v499_v8 }
  0x1b   :  { %458 = vmatpush3.bf16.msra.mxu0 %v499_v8  ;;  %491 = vmatpush3.bf16.msra.mxu1 %v499_v8 }
  0x1c   :  { %459 = vmatprep.subr.bf16.mxu0 %v500_v9  ;;  %484 = vmatprep.subr.bf16.mxu1 %v500_v9 }
  0x1f   :  { %460 = vmatpush3.bf16.msra.mxu0 %v500_v9  ;;  %492 = vmatpush3.bf16.msra.mxu1 %v500_v9 }
  0x22   :  { %462 = vmatmul.mubr.bf16.vlgmr.msra.gmra.mrb[0].mxu0 %v503_v10  ;;  %470 = vmatmul.mubr.bf16.vlgmr.msra.gmra.mrb[0].mxu1 %v504_v11 }
  0x23   :  { %465 = vmatprep.mubr.bf16.mxu0 %v505_v12  ;;  %473 = vmatprep.mubr.bf16.mxu1 %v506_v13 }
  0x2a   :  { %466 = vmatmul.mubr.bf16.gmra.mrb[4].mxu0 %v507_v14  ;;  %474 = vmatmul.mubr.bf16.gmra.mrb[4].mxu1 %v508_v15 }
  0xf5   :  { %v463_v17 = vpop.f32.mrb[0].mxu0  ;;  %v471_v18 = vpop.f32.mrb[0].mxu1 }
  0xf6   :  { %v193_v19 = vadd.f32 %v463_v17, %v580_v16  ;;  %v225_v20 = vadd.f32 %v471_v18, %v580_v16  ;;  %v184_v21 = vpop.f32.mrb[1].mxu0  ;;  %v216_v22 = vpop.f32.mrb[1].mxu1 }
  0xf7   :  { %v185_v23 = vadd.f32 %v580_v16, %v184_v21  ;;  %v217_v24 = vadd.f32 %v580_v16, %v216_v22  ;;  %v464_v25 = vpop.f32.mrb[2].mxu0  ;;  %v472_v26 = vpop.f32.mrb[2].mxu1 }
  0xf8   :  { %vm249_vm1 = vcmp.ge.f32.partialorder %v193_v19, 0.0  ;;  %v265_v27 = vmul.f32 0.1, %v193_v19  ;;  %vm257_vm2 = vcmp.ge.f32.partialorder %v225_v20, 0.0  ;;  %v273_v28 = vmul.f32 0.1, %v225_v20 }
  0xf9   :  { %vm247_vm3 = vcmp.ge.f32.partialorder %v185_v23, 0.0  ;;  %v263_v29 = vmul.f32 0.1, %v185_v23  ;;  %vm255_vm4 = vcmp.ge.f32.partialorder %v217_v24, 0.0  ;;  %v271_v30 = vmul.f32 0.1, %v217_v24 }
  0xfa   :  { %v281_v31 = vsel %vm249_vm1, %v193_v19, %v265_v27  ;;  %v289_v32 = vsel %vm257_vm2, %v225_v20, %v273_v28  ;;  %v196_v33 = vadd.f32 %v464_v25, %v580_v16  ;;  %v228_v34 = vadd.f32 %v472_v26, %v580_v16  ;;  %v187_v35 = vpop.f32.mrb[3].mxu0  ;;  %v219_v36 = vpop.f32.mrb[3].mxu1 }
  0xfb   :  { %v415_v37 = vpack.c.bf16 %v281_v31, %v281_v31  ;;  %v423_v38 = vpack.c.bf16 %v289_v32, %v289_v32  ;;  %v279_v39 = vsel %vm247_vm3, %v185_v23, %v263_v29  ;;  %v287_v40 = vsel %vm255_vm4, %v217_v24, %v271_v30 }
  0xfc   :  { %v413_v41 = vpack.c.bf16 %v279_v39, %v279_v39  ;;  %v421_v42 = vpack.c.bf16 %v287_v40, %v287_v40  ;;  %vm250_vm5 = vcmp.ge.f32.partialorder %v196_v33, 0.0  ;;  %v266_v43 = vmul.f32 0.1, %v196_v33 }
  0xfd   :  { %362 = vst.msk [vmem:[%s665_s3 + $0x8] sm:$0xf] %vm359_vm0, %v415_v37  ;;  %370 = vst.msk [vmem:[%s665_s3 + $0x28] sm:$0xf] %vm359_vm0, %v423_v38  ;;  %vm258_vm6 = vcmp.ge.f32.partialorder %v228_v34, 0.0  ;;  %v188_v45 = vadd.f32 %v580_v16, %v187_v35  ;;  %v220_v46 = vadd.f32 %v580_v16, %v219_v36  ;;  %v467_v47 = vpop.f32.mrb[4].mxu0 }
  0xfe   :  { %v274_v44 = vmul.f32 0.1, %v228_v34  ;;  %v475_v48 = vpop.f32.mrb[4].mxu1  ;;  %360 = vst.msk [vmem:[%s665_s3] sm:$0xf] %vm359_vm0, %v413_v41  ;;  %v282_v49 = vsel %vm250_vm5, %v196_v33, %v266_v43  ;;  %v209_v50 = vadd.f32 %v467_v47, %v580_v16  ;;  %v200_v52 = vpop.f32.mrb[5].mxu0 }
  0xff   :  { %368 = vst.msk [vmem:[%s665_s3 + $0x20] sm:$0xf] %vm359_vm0, %v421_v42  ;;  %v241_v51 = vadd.f32 %v475_v48, %v580_v16  ;;  %v232_v53 = vpop.f32.mrb[5].mxu1  ;;  %v416_v54 = vpack.c.bf16 %v282_v49, %v282_v49  ;;  %vm248_vm7 = vcmp.ge.f32.partialorder %v188_v45, 0.0  ;;  %v264_v56 = vmul.f32 0.1, %v188_v45 }
 0x100   :  { %v290_v55 = vsel %vm258_vm6, %v228_v34, %v274_v44  ;;  %v468_v57 = vpop.f32.mrb[6].mxu0  ;;  %v476_v58 = vpop.f32.mrb[6].mxu1  ;;  %vm256_vm8 = vcmp.ge.f32.partialorder %v220_v46, 0.0  ;;  %v272_v60 = vmul.f32 0.1, %v220_v46  ;;  %vm253_vm9 = vcmp.ge.f32.partialorder %v209_v50, 0.0 }
 0x101   :  { %v424_v59 = vpack.c.bf16 %v290_v55, %v290_v55  ;;  %v203_v61 = vpop.f32.mrb[7].mxu0  ;;  %v235_v62 = vpop.f32.mrb[7].mxu1  ;;  %363 = vst.msk [vmem:[%s665_s3 + $0xc] sm:$0xf] %vm359_vm0, %v416_v54  ;;  %v280_v63 = vsel %vm248_vm7, %v188_v45, %v264_v56  ;;  %v269_v0 = vmul.f32 0.1, %v209_v50  ;;  %v201_v4 = vadd.f32 %v580_v16, %v200_v52 }
 0x102   :  { %vm261_vm10 = vcmp.ge.f32.partialorder %v241_v51, 0.0  ;;  %v277_v1 = vmul.f32 0.1, %v241_v51  ;;  %v414_v2 = vpack.c.bf16 %v280_v63, %v280_v63  ;;  %v288_v3 = vsel %vm256_vm8, %v220_v46, %v272_v60 }
 0x103   :  { %371 = vst.msk [vmem:[%s665_s3 + $0x2c] sm:$0xf] %vm359_vm0, %v424_v59  ;;  %v233_v5 = vadd.f32 %v580_v16, %v232_v53  ;;  %v422_v6 = vpack.c.bf16 %v288_v3, %v288_v3  ;;  %v285_v7 = vsel %vm253_vm9, %v209_v50, %v269_v0  ;;  %v212_v9 = vadd.f32 %v468_v57, %v580_v16 }
 0x104   :  { %v293_v8 = vsel %vm261_vm10, %v241_v51, %v277_v1  ;;  %361 = vst.msk [vmem:[%s665_s3 + $0x4] sm:$0xf] %vm359_vm0, %v414_v2  ;;  %v419_v10 = vpack.c.bf16 %v285_v7, %v285_v7  ;;  %vm251_vm11 = vcmp.ge.f32.partialorder %v201_v4, 0.0  ;;  %v267_v12 = vmul.f32 0.1, %v201_v4 }
 0x105   :  { %v427_v11 = vpack.c.bf16 %v293_v8, %v293_v8  ;;  %369 = vst.msk [vmem:[%s665_s3 + $0x24] sm:$0xf] %vm359_vm0, %v422_v6  ;;  %vm259_vm12 = vcmp.ge.f32.partialorder %v233_v5, 0.0  ;;  %v275_v13 = vmul.f32 0.1, %v233_v5  ;;  %vm254_vm13 = vcmp.ge.f32.partialorder %v212_v9, 0.0 }
 0x106   :  { %v270_v14 = vmul.f32 0.1, %v212_v9  ;;  %366 = vst.msk [vmem:[%s665_s3 + $0x18] sm:$0xf] %vm359_vm0, %v419_v10  ;;  %v283_v15 = vsel %vm251_vm11, %v201_v4, %v267_v12  ;;  %v244_v17 = vadd.f32 %v476_v58, %v580_v16  ;;  %v204_v18 = vadd.f32 %v580_v16, %v203_v61 }
 0x107   :  { %374 = vst.msk [vmem:[%s665_s3 + $0x38] sm:$0xf] %vm359_vm0, %v427_v11  ;;  %v236_v19 = vadd.f32 %v580_v16, %v235_v62  ;;  %v417_v20 = vpack.c.bf16 %v283_v15, %v283_v15  ;;  %v291_v21 = vsel %vm259_vm12, %v233_v5, %v275_v13 }
 0x108   :  { %v286_v22 = vsel %vm254_vm13, %v212_v9, %v270_v14  ;;  %v425_v23 = vpack.c.bf16 %v291_v21, %v291_v21  ;;  %vm262_vm14 = vcmp.ge.f32.partialorder %v244_v17, 0.0  ;;  %v278_v25 = vmul.f32 0.1, %v244_v17 }
 0x109   :  { %v420_v24 = vpack.c.bf16 %v286_v22, %v286_v22  ;;  %364 = vst.msk [vmem:[%s665_s3 + $0x10] sm:$0xf] %vm359_vm0, %v417_v20  ;;  %vm252_vm15 = vcmp.ge.f32.partialorder %v204_v18, 0.0  ;;  %v268_v26 = vmul.f32 0.1, %v204_v18  ;;  %vm260_vm1 = vcmp.ge.f32.partialorder %v236_v19, 0.0 }
 0x10a   :  { %v276_v27 = vmul.f32 0.1, %v236_v19  ;;  %372 = vst.msk [vmem:[%s665_s3 + $0x30] sm:$0xf] %vm359_vm0, %v425_v23  ;;  %v294_v16 = vsel %vm262_vm14, %v244_v17, %v278_v25 }
 0x10b   :  { %367 = vst.msk [vmem:[%s665_s3 + $0x1c] sm:$0xf] %vm359_vm0, %v420_v24  ;;  %v428_v28 = vpack.c.bf16 %v294_v16, %v294_v16  ;;  %v284_v29 = vsel %vm252_vm15, %v204_v18, %v268_v26 }
 0x10c   :  { %v292_v30 = vsel %vm260_vm1, %v236_v19, %v276_v27  ;;  %v418_v31 = vpack.c.bf16 %v284_v29, %v284_v29 }
 0x10d   :  { %v426_v32 = vpack.c.bf16 %v292_v30, %v292_v30  ;;  %375 = vst.msk [vmem:[%s665_s3 + $0x3c] sm:$0xf] %vm359_vm0, %v428_v28 }
 0x10e   :  { %365 = vst.msk [vmem:[%s665_s3 + $0x14] sm:$0xf] %vm359_vm0, %v418_v31 }
 0x10f   :  { %373 = vst.msk [vmem:[%s665_s3 + $0x34] sm:$0xf] %vm359_vm0, %v426_v32 }

// kernel: encoder_forward_pallas.9
= control target key start
LH: loop header
LB: loop body
LE: loop exit
PB: predicated region body
PF: predicated region fallthrough
CT: control target
= control target key end

     0   :  { %s1198_s18 = smov 0   ;;  %s1200_s19 = smov 0   ;;  %s1346_s0 = inlined_call_operand.vmem [shape: bf16[2,10,10,8], index: 0, kind: input, shape index: {}, may-alias: {0,1,2}]   ;;  %s1347_s1 = inlined_call_operand.vmem [shape: bf16[2,10,10,8], index: 1, kind: input, shape index: {}, may-alias: {0,1,2}]   ;;  %s1348_s2 = inlined_call_operand.vmem [shape: bf16[2,10,10,8], index: 2, kind: input, shape index: {}, may-alias: {0,1,2}]   ;;  %s1349_s3 = inlined_call_operand.vmem [shape: bf16[9,8,16], index: 3, kind: input, shape index: {}]   ;;  %s1350_s4 = inlined_call_operand.vmem [shape: f32[1,16], index: 4, kind: input, shape index: {}]   ;;  %s1351_s5 = inlined_call_operand.vmem [shape: bf16[2,8,8,16], index: 5, kind: output, shape index: {}]  }
   0x1   :  { %s1202_s20 = smov 0   ;;  %s1204_s21 = smov 0  }
   0x2   :  { %s1206_s22 = smov 0  }
   0x3 LB: > { %s24_s23 = sadd.s32 1, %s1156_s20  ;;  %s27_s24 = sadd.s32 1, %s1160_s21  ;;  %s1164_s22 = sphi %s1206_s22, %s15_s22   ;;  %s1160_s21 = sphi %s1204_s21, %s1355_s21   ;;  %s1156_s20 = sphi %s1202_s20, %s1354_s20   ;;  %s1152_s19 = sphi %s1200_s19, %s1353_s19   ;;  %s1148_s18 = sphi %s1198_s18, %s1352_s18  }
   0x4   : > { %p25_p0 = scmp.ge.s32.totalorder %s24_s23, 8  ;;  %p976_p1 = scmp.ge.s32.totalorder %s1164_s22, 1 }
   0x5   : > { %p247_p2 = scmp.lt.s32.totalorder %s1164_s22, 17 }
   0x6   : > { %s1357_s23 = smov (%p25_p0, %s24_s23), 0  ;;  %s1359_s24 = smov (!%p25_p0, %s27_s24), %s1160_s21 }
   0x7   : > { %p248_p3 = pnand %p976_p1, %p247_p2  ;;  %p29_p4 = scmp.ge.s32.totalorder %s1359_s24, 2 }
   0x8   : > { %v985_v0 = vld [vmem:[%s1349_s3 + $0x4] sm:$0xf] (!%p248_p3)  ;;  %vm367_vm0 = vcmask (!%p248_p3), 1043456   ;;  %v348_v1 = vld [vmem:[%s1349_s3] sm:$0xf] (!%p248_p3)  ;;  %v1166_v2 = vmov (!%p248_p3), 0.0  }
   0x9   : > { %s1361_s24 = smov (%p29_p4, %s1359_s24), 0  ;;  %251 = sbr.rel (%p248_p3) target bundleno = 286 (0x11e), region = 40 }
   0xa   : > { %1026 = vmatprep.subr.bf16.mxu0 (!%p248_p3), %v1166_v2  ;;  %v369_v3 = vsel (!%p248_p3), %vm367_vm0, %v985_v0, 0  ;;  %1032 = vmatprep.subr.bf16.mxu1 (!%p248_p3), %v1166_v2  ;;  %v415_v4 = vsel (!%p248_p3), %vm367_vm0, %v348_v1, 0  ;;  %p302_p5 = scmp.lt.s32.totalorder (!%p248_p3), %s1152_s19, 1  ;;  %p304_p6 = scmp.lt.s32.totalorder (!%p248_p3), %s1148_s18, 9  ;;  %vm1167_vm1 = vmmov (!%p248_p3), 0   ;;  %vm363_vm2 = vcmask (!%p248_p3), 64512  }
   0xb   : > { %1027 = vmatpush3.bf16.msra.mxu0 (!%p248_p3), %v369_v3  ;;  %1033 = vmatpush3.bf16.msra.mxu1 (!%p248_p3), %v415_v4  ;;  %s311_s6 = sadd.s32 (!%p248_p3), 1, %s1148_s18  ;;  %v991_v5 = vld [vmem:[%s1349_s3 + $0xc] sm:$0xf] (!%p248_p3)  ;;  %s322_s11 = sadd.s32 (!%p248_p3), 2, %s1148_s18  ;;  %v989_v12 = vld [vmem:[%s1349_s3 + $0x8] sm:$0xf] (!%p248_p3) }
   0xc   : > { %1028 = vmatprep.mubr.msk.bf16.mxu0 (!%p248_p3), %vm1167_vm1, %v1166_v2  ;;  %1034 = vmatprep.mubr.msk.bf16.mxu1 (!%p248_p3), %vm1167_vm1, %v1166_v2  ;;  %p314_p7 = scmp.lt.s32.totalorder (!%p248_p3), %s311_s6, 9  ;;  %p325_p8 = scmp.lt.s32.totalorder (!%p248_p3), %s322_s11, 9  ;;  %v513_v6 = vsel (!%p248_p3), %vm367_vm0, %v991_v5, 0  ;;  %v996_v14 = vld [vmem:[%s1349_s3 + $0x14] sm:$0xf] (!%p248_p3)  ;;  %v464_v18 = vsel (!%p248_p3), %vm367_vm0, %v989_v12, 0 }
   0xd   : > { %1038 = vmatprep.subr.bf16.mxu0 (!%p248_p3), %v1166_v2  ;;  %1044 = vmatprep.subr.bf16.mxu1 (!%p248_p3), %v1166_v2  ;;  %v624_v21 = vsel (!%p248_p3), %vm367_vm0, %v996_v14, 0  ;;  %v993_v24 = vld [vmem:[%s1349_s3 + $0x10] sm:$0xf] (!%p248_p3)  ;;  %v1000_v28 = vld [vmem:[%s1349_s3 + $0x1c] sm:$0xf] (!%p248_p3)  ;;  %p335_p9 = scmp.lt.s32.totalorder (!%p248_p3), %s1148_s18, 7 }
   0xe   : > { %v574_v30 = vsel (!%p248_p3), %vm367_vm0, %v993_v24, 0  ;;  %v734_v31 = vsel (!%p248_p3), %vm367_vm0, %v1000_v28, 0  ;;  %v998_v36 = vld [vmem:[%s1349_s3 + $0x18] sm:$0xf] (!%p248_p3)  ;;  %v1003_v40 = vld [vmem:[%s1349_s3 + $0x20] sm:$0xf] (!%p248_p3) }
   0xf   : > { %v673_v39 = vsel (!%p248_p3), %vm367_vm0, %v998_v36, 0  ;;  %v784_v41 = vsel (!%p248_p3), %vm367_vm0, %v1003_v40, 0  ;;  %vm839_vm4 = vcmask (!%p248_p3), 125952  }
  0x10   : > { %s1363_s19 = smov (!%p302_p5, %s1152_s19), 1  ;;  %s1365_s6 = smov (!%p314_p7, %s311_s6), 9 }
  0x11   : > { %s305_s29 = scalar_select %p304_p6, %s1148_s18, 9 }
  0x12   : > { %s1080_s30 = smul.u32 20, %s1363_s19  ;;  %s1367_s11 = smov (!%p325_p8, %s322_s11), 9 }
  0x13   : > { %s977_s7 = sshll.u32 %s305_s29, 1  ;;  %s979_s16 = sshll.u32 %s1365_s6, 1 }
  0x14   : > { %s308_s10 = sadd.s32 %s1080_s30, %s977_s7  ;;  %s318_s17 = sadd.s32 %s1080_s30, %s979_s16 }
  0x15   : > { %s978_s12 = sshll.u32 %s308_s10, 2  ;;  %s981_s25 = sshll.u32 %s1367_s11, 1 }
  0x16   : > { %s310_s15 = scalar_lea.vmem %s1346_s0, %s978_s12  ;;  %s980_s28 = sshll.u32 %s318_s17, 2 }
  0x17   : > { %v342_v7 = vld [vmem:[%s310_s15] sm:$0xf]  ;;  %v343_v8 = vld [vmem:[%s310_s15 + $0x4] sm:$0x1]  ;;  %s329_s29 = sadd.s32 %s1080_s30, %s981_s25  ;;  %s320_s9 = scalar_lea.vmem %s1347_s1, %s980_s28 }
  0x18   : > { %v986_v9 = vcombine.low %v342_v7, %v343_v8  ;;  %1035 = vmatmul.mubr.msk.bf16.vlgmr.msra.gmra.mrb[0].mxu1 %vm363_vm2, %v342_v7  ;;  %s982_s6 = sshll.u32 %s329_s29, 2  ;;  %v344_v15 = vld [vmem:[%s320_s9] sm:$0xf]  ;;  %v345_v16 = vld [vmem:[%s320_s9 + $0x4] sm:$0x1]  ;;  %s1369_s18 = smov (!%p335_p9, %s1148_s18), 7 }
  0x19   : > { %1045 = vmatpush3.bf16.msra.mxu1 %v513_v6  ;;  %1046 = vmatprep.mubr.msk.bf16.mxu1 %vm1167_vm1, %v1166_v2  ;;  %s331_s14 = scalar_lea.vmem %s1348_s2, %s982_s6  ;;  %v994_v22 = vcombine.low %v344_v15, %v345_v16  ;;  %s983_s29 = sshll.u32 %s1363_s19, 3 }
  0x1a   : > { %v357_v10 = vshrl.u32 %v986_v9, 16  ;;  %v359_v11 = vshll.u32 %v986_v9, 16  ;;  %1056 = vmatprep.subr.bf16.mxu1 %v1166_v2  ;;  %v346_v19 = vld [vmem:[%s331_s14] sm:$0xf]  ;;  %v347_v20 = vld [vmem:[%s331_s14 + $0x4] sm:$0x1]  ;;  %s338_s9 = sadd.s32 %s983_s29, %s1369_s18 }
  0x1b   : > { %v1001_v23 = vcombine.low %v346_v19, %v347_v20  ;;  %v459_v25 = vrot.slane %v986_v9, 1  ;;  %v566_v26 = vshll.u32 %v994_v22, 16  ;;  %v619_v27 = vrot.slane %v994_v22, 1  ;;  %s984_s10 = sshll.u32 %s338_s9, 2 }
  0x1c   : > { %v361_v13 = vrot.slane %v359_v11, 1  ;;  %v564_v32 = vshrl.u32 %v994_v22, 16  ;;  %s340_s13 = scalar_lea.vmem %s1351_s5, %s984_s10 }
  0x1d   : > { %v726_v29 = vshll.u32 %v1001_v23, 16  ;;  %v568_v33 = vrot.slane %v566_v26, 1  ;;  %v724_v34 = vshrl.u32 %v1001_v23, 16  ;;  %v779_v42 = vrot.slane %v1001_v23, 1 }
  0x1e   : > { %v362_v17 = vor.u32 %v361_v13, %v357_v10 }
  0x1f   : > { %v728_v35 = vrot.slane %v726_v29, 1  ;;  %v569_v37 = vor.u32 %v568_v33, %v564_v32 }
  0x20   : > { %1029 = vmatmul.mubr.msk.bf16.vlgmr.msra.gmra.mrb[0].mxu0 %vm363_vm2, %v362_v17  ;;  %1047 = vmatmul.mubr.msk.bf16.vlgmr.msra.gmra.mrb[4].mxu1 %vm363_vm2, %v344_v15 }
  0x21   : > { %1039 = vmatpush3.bf16.msra.mxu0 %v464_v18  ;;  %1040 = vmatprep.mubr.msk.bf16.mxu0 %vm1167_vm1, %v1166_v2  ;;  %v729_v38 = vor.u32 %v728_v35, %v724_v34 }
  0x22   : > { %1050 = vmatprep.subr.bf16.mxu0 %v1166_v2  ;;  %1057 = vmatpush3.bf16.msra.mxu1 %v624_v21 }
  0x23   : > { %1058 = vmatprep.mubr.msk.bf16.mxu1 %vm1167_vm1, %v1166_v2  ;;  %1068 = vmatprep.subr.bf16.mxu1 %v1166_v2 }
  0x28   : > { %1041 = vmatmul.mubr.msk.bf16.vlgmr.msra.gmra.mrb[4].mxu0 %vm363_vm2, %v459_v25  ;;  %1059 = vmatmul.mubr.msk.bf16.vlgmr.msra.gmra.mrb[8].mxu1 %vm363_vm2, %v619_v27 }
  0x29   : > { %1051 = vmatpush3.bf16.msra.mxu0 %v574_v30  ;;  %1052 = vmatprep.mubr.msk.bf16.mxu0 %vm1167_vm1, %v1166_v2 }
  0x2a   : > { %1062 = vmatprep.subr.bf16.mxu0 %v1166_v2  ;;  %1069 = vmatpush3.bf16.msra.mxu1 %v734_v31 }
  0x2b   : > { %1070 = vmatprep.mubr.msk.bf16.mxu1 %vm1167_vm1, %v1166_v2 }
  0x30   : > { %1053 = vmatmul.mubr.msk.bf16.vlgmr.msra.gmra.mrb[8].mxu0 %vm363_vm2, %v569_v37  ;;  %1071 = vmatmul.mubr.msk.bf16.vlgmr.msra.gmra.mrb[12].mxu1 %vm363_vm2, %v729_v38 }
  0x31   : > { %1063 = vmatpush3.bf16.msra.mxu0 %v673_v39  ;;  %1064 = vmatprep.mubr.msk.bf16.mxu0 %vm1167_vm1, %v1166_v2 }
  0x32   : > { %1074 = vmatprep.subr.bf16.mxu0 %v1166_v2 }
  0x38   : > { %1065 = vmatmul.mubr.msk.bf16.vlgmr.msra.gmra.mrb[12].mxu0 %vm363_vm2, %v346_v19  ;;  %v1005_v19 = vld [vmem:[%s1350_s4] ss:$0 sm:$0xff] }
  0x39   : > { %1075 = vmatpush3.bf16.msra.mxu0 %v784_v41  ;;  %1076 = vmatprep.mubr.msk.bf16.mxu0 %vm1167_vm1, %v1166_v2 }
  0x40   : > { %1077 = vmatmul.mubr.msk.bf16.vlgmr.msra.gmra.mrb[16].mxu0 %vm363_vm2, %v779_v42 }
  0xeb   : > { %v451_v43 = vpop.f32.mrb[0].mxu1 }
  0xec   : > { %v1036_v44 = vpop.f32.mrb[1].mxu1 }
  0xed   : > { %v454_v45 = vpop.f32.mrb[2].mxu1 }
  0xee   : > { %v1037_v46 = vpop.f32.mrb[3].mxu1 }
  0xf3   : > { %v405_v47 = vpop.f32.mrb[0].mxu0  ;;  %v549_v48 = vpop.f32.mrb[4].mxu1 }
  0xf4   : > { %v452_v49 = vadd.f32 %v451_v43, %v405_v47  ;;  %v1030_v50 = vpop.f32.mrb[1].mxu0  ;;  %v1048_v51 = vpop.f32.mrb[5].mxu1 }
  0xf5   : > { %v408_v52 = vpop.f32.mrb[2].mxu0  ;;  %v552_v53 = vpop.f32.mrb[6].mxu1 }
  0xf6   : > { %v1031_v54 = vpop.f32.mrb[3].mxu0  ;;  %v1049_v55 = vpop.f32.mrb[7].mxu1 }
  0xfb   : > { %v500_v56 = vpop.f32.mrb[4].mxu0  ;;  %v660_v57 = vpop.f32.mrb[8].mxu1 }
  0xfc   : > { %v506_v58 = vadd.f32 %v500_v56, %v452_v49  ;;  %v1042_v59 = vpop.f32.mrb[5].mxu0  ;;  %v1060_v60 = vpop.f32.mrb[9].mxu1 }
  0xfd   : > { %v503_v61 = vpop.f32.mrb[6].mxu0  ;;  %v663_v62 = vpop.f32.mrb[10].mxu1 }
  0xfe   : > { %v555_v63 = vadd.f32 %v549_v48, %v506_v58  ;;  %v1043_v0 = vpop.f32.mrb[7].mxu0  ;;  %v1061_v1 = vpop.f32.mrb[11].mxu1 }
 0x103   : > { %v610_v2 = vpop.f32.mrb[8].mxu0  ;;  %v770_v3 = vpop.f32.mrb[12].mxu1 }
 0x104   : > { %v616_v4 = vadd.f32 %v610_v2, %v555_v63  ;;  %v1054_v5 = vpop.f32.mrb[9].mxu0  ;;  %v1072_v6 = vpop.f32.mrb[13].mxu1 }
 0x105   : > { %v613_v7 = vpop.f32.mrb[10].mxu0  ;;  %v773_v8 = vpop.f32.mrb[14].mxu1 }
 0x106   : > { %v666_v9 = vadd.f32 %v660_v57, %v616_v4  ;;  %v1055_v10 = vpop.f32.mrb[11].mxu0  ;;  %v1073_v11 = vpop.f32.mrb[15].mxu1 }
 0x10b   : > { %v709_v12 = vpop.f32.mrb[12].mxu0 }
 0x10c   : > { %v715_v13 = vadd.f32 %v709_v12, %v666_v9  ;;  %v1066_v14 = vpop.f32.mrb[13].mxu0 }
 0x10d   : > { %v712_v15 = vpop.f32.mrb[14].mxu0 }
 0x10e   : > { %v776_v16 = vadd.f32 %v770_v3, %v715_v13  ;;  %v1067_v17 = vpop.f32.mrb[15].mxu0 }
 0x113   : > { %v820_v18 = vpop.f32.mrb[16].mxu0 }
 0x114   : > { %v826_v20 = vadd.f32 %v820_v18, %v776_v16  ;;  %v1078_v21 = vpop.f32.mrb[17].mxu0 }
 0x115   : > { %v823_v22 = vpop.f32.mrb[18].mxu0 }
 0x116   : > { %v834_v23 = vadd.f32 %v1005_v19, %v826_v20  ;;  %v1079_v24 = vpop.f32.mrb[19].mxu0 }
 0x118   : > { %vm835_vm3 = vcmp.ge.f32.partialorder %v834_v23, 0.0  ;;  %v836_v25 = vmul.f32 0.1, %v834_v23 }
 0x11a   : > { %v837_v26 = vsel %vm835_vm3, %v834_v23, %v836_v25 }
 0x11b   : > { %v838_v27 = vpack.c.bf16 %v837_v26, %v837_v26 }
 0x11d   : > { %840 = vst.msk [vmem:[%s340_s13] sm:$0xf] %vm839_vm4, %v838_v27 }
 0x11e PF: > { %s15_s22 = sadd.s32 1, %s1164_s22   ;;  %s1352_s18 = smov %s1156_s20 }
 0x11f   : > { %p12_p10 = scmp.ge.s32.totalorder %s15_s22, 18   ;;  %s1353_s19 = smov %s1160_s21 }
 0x120   : > { %s1354_s20 = smov %s1357_s23  ;;  %s1355_s21 = smov %s1361_s24 }
 0x121   :  { %14 = sbr.rel (!%p12_p10) target bundleno = 3 (0x3), region = 84 }

// kernel: encoder_forward_pallas.10
= control target key start
LH: loop header
LB: loop body
LE: loop exit
PB: predicated region body
PF: predicated region fallthrough
CT: control target
= control target key end

     0   :  { %vm251_vm2 = vcmask 125952   ;;  %s450_s1 = inlined_call_operand.vmem [shape: bf16[256,16], index: 1, kind: input, shape index: {}]   ;;  %s451_s0 = inlined_call_operand.vmem [shape: bf16[32,256], index: 0, kind: input, shape index: {}]   ;;  %s452_s2 = inlined_call_operand.vmem [shape: f32[1,16], index: 2, kind: input, shape index: {}]   ;;  %s453_s3 = inlined_call_operand.vmem [shape: bf16[32,16], index: 3, kind: output, shape index: {}]  }
   0x1   :  { %v333_v0 = vld [vmem:[%s450_s1 + $0x40] sm:$0xff]   ;;  %v335_v2 = vld [vmem:[%s450_s1 + $0x48] sm:$0xff]   ;;  %v337_v4 = vld [vmem:[%s450_s1 + $0x50] sm:$0xff]  }
   0x2   :  { %v334_v1 = vld [vmem:[%s450_s1] sm:$0xff]   ;;  %289 = vmatprep.subr.bf16.mxu0 %v333_v0  ;;  %317 = vmatprep.subr.bf16.mxu1 %v333_v0  ;;  %v336_v3 = vld [vmem:[%s450_s1 + $0x8] sm:$0xff]   ;;  %v338_v5 = vld [vmem:[%s450_s1 + $0x10] sm:$0xff]  }
   0x3   :  { %290 = vmatpush3.bf16.msra.mxu0 %v334_v1  ;;  %325 = vmatpush3.bf16.msra.mxu1 %v334_v1  ;;  %v339_v6 = vld [vmem:[%s450_s1 + $0x58] sm:$0xff]   ;;  %v341_v8 = vld [vmem:[%s450_s1 + $0x60] sm:$0xff]   ;;  %v343_v10 = vld [vmem:[%s450_s1 + $0x68] sm:$0xff]  }
   0x4   :  { %291 = vmatprep.subr.bf16.mxu0 %v335_v2  ;;  %318 = vmatprep.subr.bf16.mxu1 %v335_v2  ;;  %v340_v7 = vld [vmem:[%s450_s1 + $0x18] sm:$0xff]   ;;  %v342_v9 = vld [vmem:[%s450_s1 + $0x20] sm:$0xff]   ;;  %v344_v13 = vld [vmem:[%s450_s1 + $0x28] sm:$0xff]  }
   0x5   :  { %v351_v11 = vld [vmem:[%s451_s0 + $0x4] ss:$8 sps:$4 sm:$0xff]   ;;  %v354_v12 = vld [vmem:[%s451_s0 + $0x14] ss:$8 sps:$4 sm:$0xff]   ;;  %v349_v18 = vld [vmem:[%s451_s0] ss:$8 sps:$4 sm:$0xff]  }
   0x6   :  { %v345_v14 = vld [vmem:[%s450_s1 + $0x70] sm:$0xff]   ;;  %206 = vmatprep.mubr.bf16.mxu0 %v351_v11  ;;  %214 = vmatprep.mubr.bf16.mxu1 %v354_v12  ;;  %v347_v16 = vld [vmem:[%s450_s1 + $0x78] sm:$0xff]   ;;  %v260_v22 = vld [vmem:[%s452_s2] ss:$0 sm:$0xff] }
   0x7   :  { %292 = vmatpush3.bf16.msra.mxu0 %v336_v3  ;;  %326 = vmatpush3.bf16.msra.mxu1 %v336_v3  ;;  %v346_v15 = vld [vmem:[%s450_s1 + $0x30] sm:$0xff]   ;;  %v348_v17 = vld [vmem:[%s450_s1 + $0x38] sm:$0xff]  }
   0x8   :  { %293 = vmatprep.subr.bf16.mxu0 %v337_v4  ;;  %319 = vmatprep.subr.bf16.mxu1 %v337_v4  ;;  %v352_v19 = vld [vmem:[%s451_s0 + $0x10] ss:$8 sps:$4 sm:$0xff]  }
   0xb   :  { %294 = vmatpush3.bf16.msra.mxu0 %v338_v5  ;;  %327 = vmatpush3.bf16.msra.mxu1 %v338_v5 }
   0xc   :  { %295 = vmatprep.subr.bf16.mxu0 %v339_v6  ;;  %320 = vmatprep.subr.bf16.mxu1 %v339_v6 }
   0xf   :  { %296 = vmatpush3.bf16.msra.mxu0 %v340_v7  ;;  %328 = vmatpush3.bf16.msra.mxu1 %v340_v7 }
  0x10   :  { %297 = vmatprep.subr.bf16.mxu0 %v341_v8  ;;  %321 = vmatprep.subr.bf16.mxu1 %v341_v8 }
  0x13   :  { %298 = vmatpush3.bf16.msra.mxu0 %v342_v9  ;;  %329 = vmatpush3.bf16.msra.mxu1 %v342_v9 }
  0x14   :  { %299 = vmatprep.subr.bf16.mxu0 %v343_v10  ;;  %322 = vmatprep.subr.bf16.mxu1 %v343_v10 }
  0x17   :  { %300 = vmatpush3.bf16.msra.mxu0 %v344_v13  ;;  %330 = vmatpush3.bf16.msra.mxu1 %v344_v13 }
  0x18   :  { %301 = vmatprep.subr.bf16.mxu0 %v345_v14  ;;  %323 = vmatprep.subr.bf16.mxu1 %v345_v14 }
  0x1b   :  { %302 = vmatpush3.bf16.msra.mxu0 %v346_v15  ;;  %331 = vmatpush3.bf16.msra.mxu1 %v346_v15 }
  0x1c   :  { %303 = vmatprep.subr.bf16.mxu0 %v347_v16  ;;  %324 = vmatprep.subr.bf16.mxu1 %v347_v16 }
  0x1f   :  { %304 = vmatpush3.bf16.msra.mxu0 %v348_v17  ;;  %332 = vmatpush3.bf16.msra.mxu1 %v348_v17 }
  0x22   :  { %207 = vmatmul.mubr.bf16.vlgmr.msra.gmra.mrb[0].mxu0 %v349_v18  ;;  %215 = vmatmul.mubr.bf16.vlgmr.msra.gmra.mrb[0].mxu1 %v352_v19 }
  0xf5   :  { %v305_v20 = vpop.f32.mrb[0].mxu0  ;;  %v311_v21 = vpop.f32.mrb[0].mxu1 }
  0xf6   :  { %v306_v23 = vpop.f32.mrb[1].mxu0  ;;  %v312_v24 = vpop.f32.mrb[1].mxu1 }
  0xf7   :  { %v307_v25 = vadd.f32 %v306_v23, %v305_v20  ;;  %v313_v26 = vadd.f32 %v312_v24, %v311_v21  ;;  %v308_v27 = vpop.f32.mrb[2].mxu0  ;;  %v314_v28 = vpop.f32.mrb[2].mxu1 }
  0xf8   :  { %v309_v29 = vpop.f32.mrb[3].mxu0  ;;  %v315_v30 = vpop.f32.mrb[3].mxu1 }
  0xf9   :  { %v209_v31 = vadd.f32 %v307_v25, %v260_v22  ;;  %v217_v32 = vadd.f32 %v313_v26, %v260_v22  ;;  %v310_v33 = vadd.f32 %v309_v29, %v308_v27  ;;  %v316_v34 = vadd.f32 %v315_v30, %v314_v28 }
  0xfb   :  { %vm223_vm0 = vcmp.ge.f32.partialorder %v209_v31, 0.0  ;;  %v227_v35 = vmul.f32 0.1, %v209_v31  ;;  %vm225_vm1 = vcmp.ge.f32.partialorder %v217_v32, 0.0  ;;  %v229_v36 = vmul.f32 0.1, %v217_v32 }
  0xfc   :  { %v212_v37 = vadd.f32 %v310_v33, %v260_v22  ;;  %v220_v38 = vadd.f32 %v316_v34, %v260_v22 }
  0xfd   :  { %v231_v39 = vsel %vm223_vm0, %v209_v31, %v227_v35  ;;  %v233_v40 = vsel %vm225_vm1, %v217_v32, %v229_v36 }
  0xfe   :  { %v285_v41 = vpack.c.bf16 %v231_v39, %v231_v39  ;;  %v287_v42 = vpack.c.bf16 %v233_v40, %v233_v40  ;;  %vm224_vm3 = vcmp.ge.f32.partialorder %v212_v37, 0.0  ;;  %v228_v43 = vmul.f32 0.1, %v212_v37 }
  0xff   :  { %vm226_vm4 = vcmp.ge.f32.partialorder %v220_v38, 0.0  ;;  %v230_v44 = vmul.f32 0.1, %v220_v38 }
 0x100   :  { %252 = vst.msk [vmem:[%s453_s3] sm:$0xf] %vm251_vm2, %v285_v41  ;;  %254 = vst.msk [vmem:[%s453_s3 + $0x8] sm:$0xf] %vm251_vm2, %v287_v42  ;;  %v232_v45 = vsel %vm224_vm3, %v212_v37, %v228_v43 }
 0x101   :  { %v286_v46 = vpack.c.bf16 %v232_v45, %v232_v45  ;;  %v234_v47 = vsel %vm226_vm4, %v220_v38, %v230_v44 }
 0x102   :  { %v288_v48 = vpack.c.bf16 %v234_v47, %v234_v47 }
 0x103   :  { %253 = vst.msk [vmem:[%s453_s3 + $0x4] sm:$0xf] %vm251_vm2, %v286_v46 }
 0x104   :  { %255 = vst.msk [vmem:[%s453_s3 + $0xc] sm:$0xf] %vm251_vm2, %v288_v48 }

// kernel: encoder_forward_pallas.11
= control target key start
LH: loop header
LB: loop body
LE: loop exit
PB: predicated region body
PF: predicated region fallthrough
CT: control target
= control target key end

     0   :  { %s1229_s18 = smov 0   ;;  %s1231_s19 = smov 0   ;;  %s1364_s0 = inlined_call_operand.vmem [shape: bf16[2,6,6,16], index: 0, kind: input, shape index: {}, may-alias: {0,1,2}]   ;;  %s1365_s1 = inlined_call_operand.vmem [shape: bf16[2,6,6,16], index: 1, kind: input, shape index: {}, may-alias: {0,1,2}]   ;;  %s1366_s2 = inlined_call_operand.vmem [shape: bf16[2,6,6,16], index: 2, kind: input, shape index: {}, may-alias: {0,1,2}]   ;;  %s1367_s3 = inlined_call_operand.vmem [shape: bf16[9,16,32], index: 3, kind: input, shape index: {}]   ;;  %s1368_s4 = inlined_call_operand.vmem [shape: f32[1,32], index: 4, kind: input, shape index: {}]   ;;  %s1369_s5 = inlined_call_operand.vmem [shape: bf16[2,4,4,32], index: 5, kind: output, shape index: {}]  }
   0x1   :  { %s1233_s20 = smov 0   ;;  %s1235_s21 = smov 0  }
   0x2   :  { %s1237_s22 = smov 0  }
   0x3 LB: > { %s24_s23 = sadd.s32 1, %s1187_s20  ;;  %s27_s24 = sadd.s32 1, %s1191_s21  ;;  %s1195_s22 = sphi %s1237_s22, %s15_s22   ;;  %s1191_s21 = sphi %s1235_s21, %s1373_s21   ;;  %s1187_s20 = sphi %s1233_s20, %s1372_s20   ;;  %s1183_s19 = sphi %s1231_s19, %s1371_s19   ;;  %s1179_s18 = sphi %s1229_s18, %s1370_s18  }
   0x4   : > { %p25_p0 = scmp.ge.s32.totalorder %s24_s23, 4  ;;  %p984_p1 = scmp.ge.s32.totalorder %s1195_s22, 1 }
   0x5   : > { %p244_p2 = scmp.lt.s32.totalorder %s1195_s22, 9 }
   0x6   : > { %s1375_s23 = smov (%p25_p0, %s24_s23), 0  ;;  %s1377_s24 = smov (!%p25_p0, %s27_s24), %s1191_s21 }
   0x7   : > { %p245_p3 = pnand %p984_p1, %p244_p2  ;;  %p29_p4 = scmp.ge.s32.totalorder %s1377_s24, 2 }
   0x8   : > { %v1145_v0 = vld [vmem:[%s1367_s3 + $0x8] sm:$0xff] (!%p245_p3)   ;;  %v1197_v1 = vmov (!%p245_p3), 0.0   ;;  %v1146_v2 = vld [vmem:[%s1367_s3] sm:$0xff] (!%p245_p3)   ;;  %vm1198_vm0 = vmmov (!%p245_p3), 0   ;;  %p296_p5 = scmp.lt.s32.totalorder (!%p245_p3), %s1183_s19, 1  ;;  %p298_p6 = scmp.lt.s32.totalorder (!%p245_p3), %s1179_s18, 5 }
   0x9   : > { %s1379_s24 = smov (%p29_p4, %s1377_s24), 0  ;;  %248 = sbr.rel (%p245_p3) target bundleno = 286 (0x11e), region = 40 }
   0xa   : > { %1048 = vmatprep.subr.bf16.mxu0 (!%p245_p3), %v1197_v1  ;;  %1054 = vmatprep.subr.bf16.mxu1 (!%p245_p3), %v1197_v1  ;;  %s304_s6 = sadd.s32 (!%p245_p3), 1, %s1179_s18  ;;  %s314_s8 = sadd.s32 (!%p245_p3), 2, %s1179_s18  ;;  %vm357_vm1 = vcmask (!%p245_p3), 130048   ;;  %v1149_v3 = vld [vmem:[%s1367_s3 + $0x18] sm:$0xff] (!%p245_p3)   ;;  %v1148_v9 = vld [vmem:[%s1367_s3 + $0x10] sm:$0xff] (!%p245_p3)   ;;  %v1152_v13 = vld [vmem:[%s1367_s3 + $0x28] sm:$0xff] (!%p245_p3)  }
   0xb   : > { %1049 = vmatpush3.bf16.msra.mxu0 (!%p245_p3), %v1145_v0  ;;  %1050 = vmatprep.mubr.msk.bf16.mxu0 (!%p245_p3), %vm1198_vm0, %v1197_v1  ;;  %p307_p7 = scmp.lt.s32.totalorder (!%p245_p3), %s304_s6, 5  ;;  %p317_p8 = scmp.lt.s32.totalorder (!%p245_p3), %s314_s8, 5  ;;  %v1150_v20 = vld [vmem:[%s1367_s3 + $0x20] sm:$0xff] (!%p245_p3)   ;;  %v1154_v21 = vld [vmem:[%s1367_s3 + $0x38] sm:$0xff] (!%p245_p3)   ;;  %v1153_v28 = vld [vmem:[%s1367_s3 + $0x30] sm:$0xff] (!%p245_p3)   ;;  %vm856_vm3 = vcmask (!%p245_p3), 254976  }
   0xc   : > { %1055 = vmatpush3.bf16.msra.mxu1 (!%p245_p3), %v1146_v2  ;;  %1056 = vmatprep.mubr.msk.bf16.mxu1 (!%p245_p3), %vm1198_vm0, %v1197_v1  ;;  %v1156_v29 = vld [vmem:[%s1367_s3 + $0x40] sm:$0xff] (!%p245_p3)   ;;  %p326_p9 = scmp.lt.s32.totalorder (!%p245_p3), %s1179_s18, 3 }
   0xd   : > { %1060 = vmatprep.subr.bf16.mxu0 (!%p245_p3), %v1197_v1  ;;  %1066 = vmatprep.subr.bf16.mxu1 (!%p245_p3), %v1197_v1 }
  0x10   : > { %s1381_s19 = smov (!%p296_p5, %s1183_s19), 1  ;;  %s1383_s6 = smov (!%p307_p7, %s304_s6), 5 }
  0x11   : > { %s299_s29 = scalar_select %p298_p6, %s1179_s18, 5 }
  0x12   : > { %s1102_s30 = smul.u32 6, %s1381_s19  ;;  %s1385_s8 = smov (!%p317_p8, %s314_s8), 5 }
  0x13   : > { %s1387_s18 = smov (!%p326_p9, %s1179_s18), 3  ;;  %s988_s26 = sshll.u32 %s1381_s19, 2 }
  0x14   : > { %s301_s7 = sadd.s32 %s1102_s30, %s299_s29  ;;  %s310_s15 = sadd.s32 %s1102_s30, %s1383_s6 }
  0x15   : > { %s985_s9 = sshll.u32 %s301_s7, 2  ;;  %s986_s16 = sshll.u32 %s310_s15, 2 }
  0x16   : > { %s303_s14 = scalar_lea.vmem %s1364_s0, %s985_s9  ;;  %s320_s17 = sadd.s32 %s1102_s30, %s1385_s8 }
  0x17   : > { %v333_v4 = vld [vmem:[%s303_s14] sm:$0x7]  ;;  %s312_s27 = scalar_lea.vmem %s1365_s1, %s986_s16  ;;  %s987_s28 = sshll.u32 %s320_s17, 2 }
  0x18   : > { %v992_v5 = vcombine.low %v333_v4, %v333_v4  ;;  %1057 = vmatmul.mubr.msk.bf16.vlgmr.msra.gmra.mrb[0].mxu1 %vm357_vm1, %v333_v4  ;;  %s322_s9 = scalar_lea.vmem %s1366_s2, %s987_s28  ;;  %v334_v10 = vld [vmem:[%s312_s27] sm:$0x7]  ;;  %s329_s29 = sadd.s32 %s988_s26, %s1387_s18 }
  0x19   : > { %1067 = vmatpush3.bf16.msra.mxu1 %v1149_v3  ;;  %1068 = vmatprep.mubr.msk.bf16.mxu1 %vm1198_vm0, %v1197_v1  ;;  %v335_v11 = vld [vmem:[%s322_s9] sm:$0x7]  ;;  %v1007_v14 = vcombine.low %v334_v10, %v334_v10  ;;  %s989_s7 = sshll.u32 %s329_s29, 1 }
  0x1a   : > { %v345_v6 = vshrl.u32 %v992_v5, 16  ;;  %v347_v7 = vshll.u32 %v992_v5, 16  ;;  %1078 = vmatprep.subr.bf16.mxu1 %v1197_v1  ;;  %v1020_v15 = vcombine.low %v335_v11, %v335_v11  ;;  %v453_v16 = vrot.slane %v992_v5, 1  ;;  %s331_s11 = scalar_lea.vmem %s1369_s5, %s989_s7 }
  0x1b   : > { %v566_v17 = vshll.u32 %v1007_v14, 16  ;;  %v623_v18 = vrot.slane %v1007_v14, 1  ;;  %v564_v22 = vshrl.u32 %v1007_v14, 16 }
  0x1c   : > { %v349_v8 = vrot.slane %v347_v7, 1  ;;  %v736_v19 = vshll.u32 %v1020_v15, 16  ;;  %v734_v24 = vshrl.u32 %v1020_v15, 16  ;;  %v793_v30 = vrot.slane %v1020_v15, 1  ;;  %v1027_v7 = vld [vmem:[%s1368_s4] ss:$0 sm:$0xff] }
  0x1d   : > { %v568_v23 = vrot.slane %v566_v17, 1 }
  0x1e   : > { %v350_v12 = vor.u32 %v349_v8, %v345_v6  ;;  %v738_v25 = vrot.slane %v736_v19, 1 }
  0x1f   : > { %v569_v26 = vor.u32 %v568_v23, %v564_v22 }
  0x20   : > { %1051 = vmatmul.mubr.msk.bf16.vlgmr.msra.gmra.mrb[0].mxu0 %vm357_vm1, %v350_v12  ;;  %1069 = vmatmul.mubr.msk.bf16.vlgmr.msra.gmra.mrb[4].mxu1 %vm357_vm1, %v334_v10  ;;  %v739_v27 = vor.u32 %v738_v25, %v734_v24 }
  0x21   : > { %1061 = vmatpush3.bf16.msra.mxu0 %v1148_v9  ;;  %1062 = vmatprep.mubr.msk.bf16.mxu0 %vm1198_vm0, %v1197_v1 }
  0x22   : > { %1072 = vmatprep.subr.bf16.mxu0 %v1197_v1  ;;  %1079 = vmatpush3.bf16.msra.mxu1 %v1152_v13 }
  0x23   : > { %1080 = vmatprep.mubr.msk.bf16.mxu1 %vm1198_vm0, %v1197_v1  ;;  %1090 = vmatprep.subr.bf16.mxu1 %v1197_v1 }
  0x28   : > { %1063 = vmatmul.mubr.msk.bf16.vlgmr.msra.gmra.mrb[4].mxu0 %vm357_vm1, %v453_v16  ;;  %1081 = vmatmul.mubr.msk.bf16.vlgmr.msra.gmra.mrb[8].mxu1 %vm357_vm1, %v623_v18 }
  0x29   : > { %1073 = vmatpush3.bf16.msra.mxu0 %v1150_v20  ;;  %1074 = vmatprep.mubr.msk.bf16.mxu0 %vm1198_vm0, %v1197_v1 }
  0x2a   : > { %1084 = vmatprep.subr.bf16.mxu0 %v1197_v1  ;;  %1091 = vmatpush3.bf16.msra.mxu1 %v1154_v21 }
  0x2b   : > { %1092 = vmatprep.mubr.msk.bf16.mxu1 %vm1198_vm0, %v1197_v1 }
  0x30   : > { %1075 = vmatmul.mubr.msk.bf16.vlgmr.msra.gmra.mrb[8].mxu0 %vm357_vm1, %v569_v26  ;;  %1093 = vmatmul.mubr.msk.bf16.vlgmr.msra.gmra.mrb[12].mxu1 %vm357_vm1, %v739_v27 }
  0x31   : > { %1085 = vmatpush3.bf16.msra.mxu0 %v1153_v28  ;;  %1086 = vmatprep.mubr.msk.bf16.mxu0 %vm1198_vm0, %v1197_v1 }
  0x32   : > { %1096 = vmatprep.subr.bf16.mxu0 %v1197_v1 }
  0x38   : > { %1087 = vmatmul.mubr.msk.bf16.vlgmr.msra.gmra.mrb[12].mxu0 %vm357_vm1, %v335_v11 }
  0x39   : > { %1097 = vmatpush3.bf16.msra.mxu0 %v1156_v29  ;;  %1098 = vmatprep.mubr.msk.bf16.mxu0 %vm1198_vm0, %v1197_v1 }
  0x40   : > { %1099 = vmatmul.mubr.msk.bf16.vlgmr.msra.gmra.mrb[16].mxu0 %vm357_vm1, %v793_v30 }
  0xeb   : > { %v444_v31 = vpop.f32.mrb[0].mxu1 }
  0xec   : > { %v1058_v32 = vpop.f32.mrb[1].mxu1 }
  0xed   : > { %v447_v33 = vpop.f32.mrb[2].mxu1 }
  0xee   : > { %v1059_v34 = vpop.f32.mrb[3].mxu1 }
  0xf3   : > { %v395_v35 = vpop.f32.mrb[0].mxu0  ;;  %v550_v36 = vpop.f32.mrb[4].mxu1 }
  0xf4   : > { %v445_v37 = vadd.f32 %v444_v31, %v395_v35  ;;  %v1052_v38 = vpop.f32.mrb[1].mxu0  ;;  %v1070_v39 = vpop.f32.mrb[5].mxu1 }
  0xf5   : > { %v398_v40 = vpop.f32.mrb[2].mxu0  ;;  %v553_v41 = vpop.f32.mrb[6].mxu1 }
  0xf6   : > { %v1053_v42 = vpop.f32.mrb[3].mxu0  ;;  %v1071_v43 = vpop.f32.mrb[7].mxu1 }
  0xfb   : > { %v497_v44 = vpop.f32.mrb[4].mxu0  ;;  %v667_v45 = vpop.f32.mrb[8].mxu1 }
  0xfc   : > { %v503_v46 = vadd.f32 %v497_v44, %v445_v37  ;;  %v1064_v47 = vpop.f32.mrb[5].mxu0  ;;  %v1082_v48 = vpop.f32.mrb[9].mxu1 }
  0xfd   : > { %v500_v49 = vpop.f32.mrb[6].mxu0  ;;  %v670_v50 = vpop.f32.mrb[10].mxu1 }
  0xfe   : > { %v556_v51 = vadd.f32 %v550_v36, %v503_v46  ;;  %v1065_v52 = vpop.f32.mrb[7].mxu0  ;;  %v1083_v53 = vpop.f32.mrb[11].mxu1 }
 0x103   : > { %v613_v54 = vpop.f32.mrb[8].mxu0  ;;  %v783_v55 = vpop.f32.mrb[12].mxu1 }
 0x104   : > { %v619_v56 = vadd.f32 %v613_v54, %v556_v51  ;;  %v1076_v57 = vpop.f32.mrb[9].mxu0  ;;  %v1094_v58 = vpop.f32.mrb[13].mxu1 }
 0x105   : > { %v616_v59 = vpop.f32.mrb[10].mxu0  ;;  %v786_v60 = vpop.f32.mrb[14].mxu1 }
 0x106   : > { %v673_v61 = vadd.f32 %v667_v45, %v619_v56  ;;  %v1077_v62 = vpop.f32.mrb[11].mxu0  ;;  %v1095_v63 = vpop.f32.mrb[15].mxu1 }
 0x10b   : > { %v720_v0 = vpop.f32.mrb[12].mxu0 }
 0x10c   : > { %v726_v1 = vadd.f32 %v720_v0, %v673_v61  ;;  %v1088_v2 = vpop.f32.mrb[13].mxu0 }
 0x10d   : > { %v723_v3 = vpop.f32.mrb[14].mxu0 }
 0x10e   : > { %v789_v4 = vadd.f32 %v783_v55, %v726_v1  ;;  %v1089_v5 = vpop.f32.mrb[15].mxu0 }
 0x113   : > { %v837_v6 = vpop.f32.mrb[16].mxu0 }
 0x114   : > { %v843_v8 = vadd.f32 %v837_v6, %v789_v4  ;;  %v1100_v9 = vpop.f32.mrb[17].mxu0 }
 0x115   : > { %v840_v10 = vpop.f32.mrb[18].mxu0 }
 0x116   : > { %v851_v11 = vadd.f32 %v1027_v7, %v843_v8  ;;  %v1101_v12 = vpop.f32.mrb[19].mxu0 }
 0x118   : > { %vm852_vm2 = vcmp.ge.f32.partialorder %v851_v11, 0.0  ;;  %v853_v13 = vmul.f32 0.1, %v851_v11 }
 0x11a   : > { %v854_v14 = vsel %vm852_vm2, %v851_v11, %v853_v13 }
 0x11b   : > { %v855_v15 = vpack.c.bf16 %v854_v14, %v854_v14 }
 0x11d   : > { %857 = vst.msk [vmem:[%s331_s11] sm:$0x3] %vm856_vm3, %v855_v15 }
 0x11e PF: > { %s15_s22 = sadd.s32 1, %s1195_s22   ;;  %s1370_s18 = smov %s1187_s20 }
 0x11f   : > { %p12_p10 = scmp.ge.s32.totalorder %s15_s22, 10   ;;  %s1371_s19 = smov %s1191_s21 }
 0x120   : > { %s1372_s20 = smov %s1375_s23  ;;  %s1373_s21 = smov %s1379_s24 }
 0x121   :  { %14 = sbr.rel (!%p12_p10) target bundleno = 3 (0x3), region = 84 }

// kernel: encoder_forward_pallas.12
= control target key start
LH: loop header
LB: loop body
LE: loop exit
PB: predicated region body
PF: predicated region fallthrough
CT: control target
= control target key end

     0   :  { %vm378_vm1 = vcmask 257024   ;;  %s629_s1 = inlined_call_operand.vmem [shape: bf16[512,32], index: 1, kind: input, shape index: {}]   ;;  %s630_s0 = inlined_call_operand.vmem [shape: bf16[8,512], index: 0, kind: input, shape index: {}]   ;;  %s631_s2 = inlined_call_operand.vmem [shape: f32[1,32], index: 2, kind: input, shape index: {}]   ;;  %s632_s3 = inlined_call_operand.vmem [shape: bf16[8,32], index: 3, kind: output, shape index: {}]  }
   0x1   :  { %v465_v0 = vld [vmem:[%s629_s1 + $0x40] sm:$0xff]   ;;  %v469_v4 = vld [vmem:[%s629_s1 + $0x48] sm:$0xff]   ;;  %v473_v8 = vld [vmem:[%s629_s1 + $0x50] sm:$0xff]  }
   0x2   :  { %v466_v1 = vld [vmem:[%s629_s1 + $0xc0] sm:$0xff]   ;;  %421 = vmatprep.subr.bf16.mxu0 %v465_v0  ;;  %v470_v5 = vld [vmem:[%s629_s1 + $0xc8] sm:$0xff]   ;;  %v474_v9 = vld [vmem:[%s629_s1 + $0xd0] sm:$0xff]  }
   0x3   :  { %v467_v2 = vld [vmem:[%s629_s1] sm:$0xff]   ;;  %443 = vmatprep.subr.bf16.mxu1 %v466_v1  ;;  %v471_v6 = vld [vmem:[%s629_s1 + $0x8] sm:$0xff]   ;;  %v475_v10 = vld [vmem:[%s629_s1 + $0x10] sm:$0xff]  }
   0x4   :  { %v468_v3 = vld [vmem:[%s629_s1 + $0x80] sm:$0xff]   ;;  %422 = vmatpush3.bf16.msra.mxu0 %v467_v2  ;;  %v472_v7 = vld [vmem:[%s629_s1 + $0x88] sm:$0xff]   ;;  %v476_v11 = vld [vmem:[%s629_s1 + $0x90] sm:$0xff]  }
   0x5   :  { %444 = vmatpush3.bf16.msra.mxu1 %v468_v3  ;;  %423 = vmatprep.subr.bf16.mxu0 %v469_v4  ;;  %v477_v12 = vld [vmem:[%s629_s1 + $0x58] sm:$0xff]   ;;  %v481_v16 = vld [vmem:[%s629_s1 + $0x60] sm:$0xff]   ;;  %v485_v20 = vld [vmem:[%s629_s1 + $0x68] sm:$0xff]  }
   0x6   :  { %445 = vmatprep.subr.bf16.mxu1 %v470_v5  ;;  %v478_v13 = vld [vmem:[%s629_s1 + $0xd8] sm:$0xff]   ;;  %v482_v17 = vld [vmem:[%s629_s1 + $0xe0] sm:$0xff]   ;;  %v486_v21 = vld [vmem:[%s629_s1 + $0xe8] sm:$0xff]  }
   0x7   :  { %v479_v14 = vld [vmem:[%s629_s1 + $0x18] sm:$0xff]   ;;  %v483_v18 = vld [vmem:[%s629_s1 + $0x20] sm:$0xff]   ;;  %v487_v22 = vld [vmem:[%s629_s1 + $0x28] sm:$0xff]  }
   0x8   :  { %424 = vmatpush3.bf16.msra.mxu0 %v471_v6  ;;  %v480_v15 = vld [vmem:[%s629_s1 + $0x98] sm:$0xff]   ;;  %v484_v19 = vld [vmem:[%s629_s1 + $0xa0] sm:$0xff]   ;;  %v488_v23 = vld [vmem:[%s629_s1 + $0xa8] sm:$0xff]  }
   0x9   :  { %446 = vmatpush3.bf16.msra.mxu1 %v472_v7  ;;  %425 = vmatprep.subr.bf16.mxu0 %v473_v8  ;;  %v489_v24 = vld [vmem:[%s629_s1 + $0x70] sm:$0xff]   ;;  %v493_v28 = vld [vmem:[%s629_s1 + $0x78] sm:$0xff]   ;;  %v15_v32 = vld [vmem:[%s630_s0] sm:$0xff] }
   0xa   :  { %447 = vmatprep.subr.bf16.mxu1 %v474_v9  ;;  %v490_v25 = vld [vmem:[%s629_s1 + $0xf0] sm:$0xff]   ;;  %v494_v29 = vld [vmem:[%s629_s1 + $0xf8] sm:$0xff]   ;;  %v16_v33 = vld [vmem:[%s630_s0 + $0x8] sm:$0xff]  ;;  %v385_v34 = vcombine.low %v15_v32, %v15_v32  ;;  %v386_v35 = vcombine.high %v15_v32, %v15_v32 }
   0xb   :  { %v491_v26 = vld [vmem:[%s629_s1 + $0x30] sm:$0xff]   ;;  %v495_v30 = vld [vmem:[%s629_s1 + $0x38] sm:$0xff]   ;;  %v387_v36 = vcombine.low %v16_v33, %v16_v33  ;;  %v388_v37 = vcombine.high %v16_v33, %v16_v33  ;;  %v384_v40 = vld [vmem:[%s631_s2] ss:$0 sm:$0xff] }
   0xc   :  { %426 = vmatpush3.bf16.msra.mxu0 %v475_v10  ;;  %v492_v27 = vld [vmem:[%s629_s1 + $0xb0] sm:$0xff]   ;;  %v496_v31 = vld [vmem:[%s629_s1 + $0xb8] sm:$0xff]   ;;  %326 = vmatprep.mubr.bf16.mxu0 %v386_v35 }
   0xd   :  { %448 = vmatpush3.bf16.msra.mxu1 %v476_v11  ;;  %427 = vmatprep.subr.bf16.mxu0 %v477_v12 }
   0xe   :  { %449 = vmatprep.subr.bf16.mxu1 %v478_v13  ;;  %366 = vmatprep.mubr.bf16.mxu1 %v388_v37 }
  0x10   :  { %428 = vmatpush3.bf16.msra.mxu0 %v479_v14 }
  0x11   :  { %450 = vmatpush3.bf16.msra.mxu1 %v480_v15  ;;  %429 = vmatprep.subr.bf16.mxu0 %v481_v16 }
  0x12   :  { %451 = vmatprep.subr.bf16.mxu1 %v482_v17 }
  0x14   :  { %430 = vmatpush3.bf16.msra.mxu0 %v483_v18 }
  0x15   :  { %452 = vmatpush3.bf16.msra.mxu1 %v484_v19  ;;  %431 = vmatprep.subr.bf16.mxu0 %v485_v20 }
  0x16   :  { %453 = vmatprep.subr.bf16.mxu1 %v486_v21 }
  0x18   :  { %432 = vmatpush3.bf16.msra.mxu0 %v487_v22 }
  0x19   :  { %454 = vmatpush3.bf16.msra.mxu1 %v488_v23  ;;  %433 = vmatprep.subr.bf16.mxu0 %v489_v24 }
  0x1a   :  { %455 = vmatprep.subr.bf16.mxu1 %v490_v25 }
  0x1c   :  { %434 = vmatpush3.bf16.msra.mxu0 %v491_v26 }
  0x1d   :  { %456 = vmatpush3.bf16.msra.mxu1 %v492_v27  ;;  %435 = vmatprep.subr.bf16.mxu0 %v493_v28 }
  0x1e   :  { %457 = vmatprep.subr.bf16.mxu1 %v494_v29 }
  0x20   :  { %436 = vmatpush3.bf16.msra.mxu0 %v495_v30 }
  0x21   :  { %458 = vmatpush3.bf16.msra.mxu1 %v496_v31 }
  0x23   :  { %327 = vmatmul.mubr.bf16.vlgmr.msra.gmra.mrb[0].mxu0 %v385_v34 }
  0x24   :  { %367 = vmatmul.mubr.bf16.vlgmr.msra.gmra.mrb[0].mxu1 %v387_v36 }
  0xf6   :  { %v437_v38 = vpop.f32.mrb[0].mxu0 }
  0xf7   :  { %v459_v39 = vpop.f32.mrb[0].mxu1  ;;  %v438_v41 = vpop.f32.mrb[1].mxu0 }
  0xf8   :  { %v460_v42 = vpop.f32.mrb[1].mxu1  ;;  %v439_v43 = vadd.f32 %v438_v41, %v437_v38  ;;  %v440_v45 = vpop.f32.mrb[2].mxu0 }
  0xf9   :  { %v461_v44 = vadd.f32 %v460_v42, %v459_v39  ;;  %v462_v46 = vpop.f32.mrb[2].mxu1  ;;  %v441_v47 = vpop.f32.mrb[3].mxu0 }
  0xfa   :  { %v463_v48 = vpop.f32.mrb[3].mxu1  ;;  %v329_v49 = vadd.f32 %v439_v43, %v384_v40 }
  0xfc   :  { %v369_v50 = vadd.f32 %v461_v44, %v329_v49 }
  0xfe   :  { %vm374_vm0 = vcmp.ge.f32.partialorder %v369_v50, 0.0  ;;  %v375_v51 = vmul.f32 0.1, %v369_v50 }
 0x100   :  { %v376_v52 = vsel %vm374_vm0, %v369_v50, %v375_v51 }
 0x101   :  { %v377_v53 = vpack.c.bf16 %v376_v52, %v376_v52 }
 0x103   :  { %379 = vst.msk [vmem:[%s632_s3] sm:$0xf] %vm378_vm1, %v377_v53 }

// kernel: encoder_forward_pallas.13
= control target key start
LH: loop header
LB: loop body
LE: loop exit
PB: predicated region body
PF: predicated region fallthrough
CT: control target
= control target key end

     0   :  { %vm13_vm0 = vcmask 254976   ;;  %v89_v2 = vmov 0.0   ;;  %vm20_vm1 = vcmask 257024   ;;  %s122_s0 = inlined_call_operand.vmem [shape: bf16[2,4,32], index: 0, kind: input, shape index: {}]   ;;  %s123_s1 = inlined_call_operand.hbm [shape: f32[2,32], index: 1, kind: output, shape index: {}]  }
   0x1   :  { %v16_v0 = vld [vmem:[%s122_s0] sm:$0x3]  ;;  %v17_v1 = vld [vmem:[%s122_s0 + $0x2] sm:$0x3]  ;;  %14 = vst.msk [vmem:[#allocation2] sm:$0x3] %vm13_vm0, %v89_v2 }
   0x2   :  { %v18_v3 = vunpack.c.l.bf16 %v16_v0  ;;  %v19_v4 = vunpack.c.l.bf16 %v17_v1 }
   0x3   :  { %6 = vsyncpa [#allocation3], 0  ;;  %vm37_vm2 = vcmask 1041409   ;;  %s90_s0 = smov [#allocation2]  }
   0x4   :  { %v21_v5 = vsel %vm20_vm1, %v18_v3, 0.0  ;;  %v28_v6 = vsel %vm20_vm1, %v19_v4, 0.0  ;;  %s55_s10 = sshll.u32 %s90_s0, 4  ;;  %s56_s10 = int_to_ptr.vmem [resolvable:$true] %s55_s10 }
   0x5   :  { %v22_v7 = vrot.slane %v21_v5, 4  ;;  %v29_v8 = vrot.slane %v28_v6, 4  ;;  %s65_s11 = scalar_lea.vmem %s56_s10, 32  ;;  %p70_p1 = scmp.lt.s32.totalorder %s56_s10, %s56_s10 }
   0x6   :  { %p66_p0 = scmp.ne.s32.totalorder %s56_s10, %s65_s11  ;;  %p71_p2 = scmp.lt.s32.totalorder %s65_s11, %s65_s11 }
   0x7   :  { %v23_v9 = vadd.f32 %v22_v7, %v21_v5  ;;  %v30_v10 = vadd.f32 %v29_v8, %v28_v6 }
   0x8   :  { %v15_v17 = vld [vmem:[#allocation2] sm:$0x3]  ;;  %p72_p3 = por %p71_p2, %p70_p1 }
   0x9   :  { %v24_v11 = vrot.slane %v23_v9, 2  ;;  %v31_v12 = vrot.slane %v30_v10, 2 }
   0xa   :  { %p73_p4 = pnand %p72_p3, %p66_p0 }
   0xb   :  { %v25_v13 = vadd.f32 %v24_v11, %v23_v9  ;;  %v32_v14 = vadd.f32 %v31_v12, %v30_v10 }
   0xd   :  { %v26_v15 = vrot.slane %v25_v13, 1  ;;  %v33_v16 = vrot.slane %v32_v14, 1 }
   0xf   :  { %v27_v18 = vadd.f32 %v26_v15, %v25_v13  ;;  %v34_v19 = vadd.f32 %v33_v16, %v32_v14 }
  0x11   :  { %v38_v20 = vsel %vm37_vm2, %v34_v19, %v27_v18 }
  0x12   :  { %v40_v21 = vadd.f32 %v38_v20, %v15_v17 }
  0x14   :  { %42 = vst.msk [vmem:[#allocation2] sm:$0x3] %vm13_vm0, %v40_v21 }
  0x1b   :  { %v46_v22 = vld [vmem:[#allocation2] sm:$0x3] }
  0x1c   :  { %v47_v23 = vmul.f32 0.25, %v46_v22 }
  0x1e   :  { %48 = vst.msk [vmem:[#allocation2] sm:$0x3] %vm13_vm0, %v47_v23 }
  0x1f   :  { %76 = shalt.err (!%p73_p4)
}
  0x20   :  { %s77_s14 = scalar_lea.hbm %s123_s1, 32 }
  0x21   :  { %p78_p5 = scmp.ne.s32.totalorder %s123_s1, %s77_s14  ;;  %p81_p6 = scmp.lt.u32.totalorder %s77_s14, %s123_s1 }
  0x23   :  { %p83_p7 = pnand %p81_p6, %p78_p5 }
  0x25   :  { %86 = shalt.err (!%p83_p7)
}
  0x26   :  { %58 = dma.vmem_to_hbm [thread:$0]  %s56_s10, 32, %s123_s1, [#allocation3]  }
  0x27   :  { %87 = dma.done.wait [#allocation3], 32  }
  0x28   :  { %88 = vsyncadd [#allocation3], 4294967264 }
  0x29   :  { %62 = vsyncpa [#allocation3], 1 }

</bundles_post_ra>
